<compile_context>
chip_gen: v6e
topology: v6e:2x2x1
jax: 0.10.0
libtpu: 0.0.40
codegen_flags: <defaults>
</compile_context>

<pallas_src>
import functools

import jax
import jax.numpy as jnp
from jax.experimental import pallas as pl
from jax.experimental.pallas import tpu as pltpu


# ---------------------------------------------------------------------------
# host-side helpers
# ---------------------------------------------------------------------------
def _vmem_limit_bytes():
    """Generation-aware VMEM budget: ~3/4 of physical, capped at 112 MiB."""
    try:
        cap = int(pltpu.get_tpu_info().vmem_capacity_bytes)
    except Exception:
        cap = 64 * 1024 * 1024
    return int(max(16 * 1024 * 1024, min(cap * 3 // 4, 112 * 1024 * 1024)))


def _block_diag(w, g):
    """g copies of w on the diagonal -> (g*I, g*J)."""
    eye = jnp.eye(g, dtype=w.dtype)
    i, j = w.shape
    return jnp.einsum('ab,ij->aibj', eye, w).reshape(g * i, g * j)


def _tile_row(v, g):
    """(1, H) row vector tiled to (1, g*H) (lane-group layout)."""
    return jnp.tile(v, (1, g))


def _permute_pack_order(arr, g):
    """(Wn, L, ...) -> flat (M, ...) in (quad, position, group) order so that a
    row-major reshape to (M//g, g*F) packs g walks side by side along lanes."""
    wn, L = arr.shape[0], arr.shape[1]
    rest = arr.shape[2:]
    a = arr.reshape(wn // g, g, L, *rest)
    a = jnp.swapaxes(a, 1, 2)
    return a.reshape(wn // g * L * g, *rest)


def _pick_quad_tile(nq, walk_len, max_rows=256):
    """Largest tq dividing nq with (tq*L) % 8 == 0 and tq*L <= max_rows
    (256-row cap keeps vreg pressure modest; full-array fallback is always legal)."""
    best = None
    for tq in range(1, nq + 1):
        if nq % tq == 0 and (tq * walk_len) % 8 == 0 and tq * walk_len <= max_rows:
            best = tq
    return best if best is not None else nq


def _pick_row_tile(mp, max_rows=512):
    best = None
    t = 8
    while t <= min(mp, max_rows):
        if mp % t == 0:
            best = t
        t += 8
    return best if best is not None else mp


def _pick_m_tile(m, n, budget):
    """Contraction-axis tile for the aggregation; multiple of 128, sized from n and
    the VMEM budget (onehot bf16 + walk_flat f32, double buffered)."""
    if m % 128 != 0:
        return m
    per_col = 2 * (n * 2 + 32 * 4) + 64
    cap = max(128, min(4096, (budget // 4) // per_col))
    cap = (cap // 128) * 128
    best = None
    t = 128
    while t <= m:
        if m % t == 0 and t <= max(cap, 128):
            best = t
        t += 128
    return best if best is not None else m


# ---------------------------------------------------------------------------
# Kernel 1a: walk-feature build + LayerNorm + depthwise conv (+ per-tile BN stats)
# lane-packed layout: each row = G walks x H channels; grid = (walk_tile,) "parallel"
# ---------------------------------------------------------------------------
def _walk_seq_kernel(gx_ref, cat_ref, Wc_ref, bc_ref, lng_ref, lnb_ref, gm_ref,
                     dww_ref, dwb_ref, acc_ref, stats_ref, *, walk_len, d_conv):
    L = walk_len
    K = d_conv
    pad = K // 2

    # ---- feature build: walk_x + (walk_e || walk_pe) @ [We; Wp]_blockdiag + bias ----
    wx = gx_ref[...] + jnp.dot(cat_ref[...], Wc_ref[...],
                               preferred_element_type=jnp.float32) + bc_ref[...]

    # ---- LayerNorm per original row (= per 32-lane group), two-pass variance.
    # Group mean via a block-diagonal (1/H) matmul on the MXU: no cross-lane XLU
    # reduce, no unpack/relayout.
    gmean = gm_ref[...]
    mu = jnp.dot(wx, gmean, preferred_element_type=jnp.float32)
    xc = wx - mu
    var = jnp.dot(xc * xc, gmean, preferred_element_type=jnp.float32)
    wx = xc * jax.lax.rsqrt(var + 1e-5) * lng_ref[...] + lnb_ref[...]

    # ---- depthwise conv along walk positions.  Positions are consecutive sublanes,
    # so every tap is a sublane pltpu.roll (XLU); per-walk zero padding (and roll
    # wrap-around, which only occurs at walk boundaries) is handled by the lpos mask.
    R = wx.shape[0]
    lpos = jax.lax.broadcasted_iota(jnp.int32, (R, 1), 0) % L
    dww = dww_ref[...]                                   # (K, G*H)
    acc = wx * dww[pad:pad + 1, :]                       # off = 0 tap
    for k in range(K):
        off = k - pad
        if off == 0:
            continue
        tap = pltpu.roll(wx, shift=(-off) % R, axis=0)
        valid = jnp.logical_and(lpos + off >= 0, lpos + off <= L - 1)
        acc = acc + jnp.where(valid, tap, 0.0) * dww[k:k + 1, :]
    acc = acc + dwb_ref[...]

    acc_ref[...] = acc                                   # lane-dense HBM intermediate
    # per-tile BatchNorm partial statistics (combined host-side)
    stats_ref[...] = jnp.zeros(stats_ref.shape, stats_ref.dtype)
    stats_ref[0:1, :] = jnp.sum(acc, axis=0, keepdims=True)
    stats_ref[1:2, :] = jnp.sum(acc * acc, axis=0, keepdims=True)


# ---------------------------------------------------------------------------
# Kernel 1b: BatchNorm affine + ReLU + pointwise conv (block-diag matmul) + ReLU
# grid = (row_tile,) "parallel"; lane-dense output
# ---------------------------------------------------------------------------
def _bn_pointwise_kernel(acc_ref, sc_ref, sh_ref, pw_ref, pwb_ref, out_ref):
    h = jnp.maximum(acc_ref[...] * sc_ref[...] + sh_ref[...], 0.0)
    y = jnp.dot(h, pw_ref[...], preferred_element_type=jnp.float32) + pwb_ref[...]
    out_ref[...] = jnp.maximum(y, 0.0)


# ---------------------------------------------------------------------------
# Kernel 2: scatter_mean (binary bf16 one-hot matmul accumulated over M tiles,
# 1/count applied after accumulation) + out_*_proj MLP + residual.
# grid = (m_tile,) "arbitrary" (contraction axis; MLP fused at the last step)
# ---------------------------------------------------------------------------
def _agg_mlp_kernel(oh_ref, wf_ref, inv_ref, base_ref, w1_ref, b1_ref,
                    bng_ref, bnb_ref, w2_ref, b2_ref, out_ref, agg_scr):
    m = pl.program_id(0)

    @pl.when(m == 0)
    def _init():
        agg_scr[...] = jnp.zeros_like(agg_scr)

    agg_scr[...] += jnp.dot(oh_ref[...].astype(jnp.float32), wf_ref[...],
                            preferred_element_type=jnp.float32)

    @pl.when(m == pl.num_programs(0) - 1)
    def _mlp():
        agg = agg_scr[...] * inv_ref[...]
        h = jnp.dot(agg, w1_ref[...], preferred_element_type=jnp.float32) + b1_ref[...]
        mu = jnp.mean(h, axis=0, keepdims=True)
        hc = h - mu
        var = jnp.mean(hc * hc, axis=0, keepdims=True)
        h = jnp.maximum(hc * jax.lax.rsqrt(var + 1e-5) * bng_ref[...] + bnb_ref[...], 0.0)
        out_ref[...] = base_ref[...] + jnp.dot(
            h, w2_ref[...], preferred_element_type=jnp.float32) + b2_ref[...]


# ---------------------------------------------------------------------------
# Wrapper
# ---------------------------------------------------------------------------
def walk_encoder_forward(params, x, edge_attr, walk_node_idx, walk_edge_idx,
                         walk_node_mask, walk_edge_mask, walk_pe):
    f32 = jnp.float32
    Wn, L = walk_node_idx.shape
    H = x.shape[-1]
    P = walk_pe.shape[-1]
    K = params['dw_w'].shape[0]
    M = Wn * L

    # lane-pack factor: G walks side by side along lanes (4 * 32 = 128 lanes)
    G = 4 if Wn % 4 == 0 else (2 if Wn % 2 == 0 else 1)
    GH = G * H
    Mp = M // G
    vmem_limit = _vmem_limit_bytes()

    # ---- wrapper-side prep (XLA): permuted gathers, masking fused with the gather,
    #      packing is then a free row-major reshape ----
    wni = _permute_pack_order(walk_node_idx, G)
    wei = _permute_pack_order(walk_edge_idx, G)
    wnm = _permute_pack_order(walk_node_mask, G)
    wem = _permute_pack_order(walk_edge_mask, G)
    pe = _permute_pack_order(walk_pe, G).astype(f32)                   # (M, P)

    gx = jnp.where(wnm[:, None], 0.0, x[wni].astype(f32))              # (M, H)
    ge = jnp.where(wem[:, None], 0.0, edge_attr[wei].astype(f32))      # (M, H)
    cat = jnp.concatenate([ge, pe], axis=-1)                           # (M, H+P)

    gx_p = gx.reshape(Mp, GH)
    cat_p = cat.reshape(Mp, G * (H + P))

    # ---- packed / block-diagonal weights (tiny, built once) ----
    Wc_bd = _block_diag(jnp.concatenate([params['We'], params['Wp']], axis=0), G)
    bc_t = _tile_row(params['be'] + params['bp'], G)
    lng_t = _tile_row(params['ln_g'], G)
    lnb_t = _tile_row(params['ln_b'], G)
    gmean = _block_diag(jnp.full((H, H), 1.0 / H, dtype=f32), G)
    dww_t = jnp.tile(params['dw_w'], (1, G))                           # (K, GH)
    dwb_t = _tile_row(params['dw_b'], G)

    # ---- kernel 1a ----
    nq = Wn // G
    tq = _pick_quad_tile(nq, L)
    Rt = tq * L
    nt = Mp // Rt

    def w_spec1(a):
        return pl.BlockSpec(a.shape, lambda t: (0,) * a.ndim)

    acc_p, stats = pl.pallas_call(
        functools.partial(_walk_seq_kernel, walk_len=L, d_conv=K),
        grid=(nt,),
        out_shape=(jax.ShapeDtypeStruct((Mp, GH), f32),
                   jax.ShapeDtypeStruct((nt * 8, GH), f32)),
        in_specs=[pl.BlockSpec((Rt, GH), lambda t: (t, 0)),
                  pl.BlockSpec((Rt, G * (H + P)), lambda t: (t, 0)),
                  w_spec1(Wc_bd), w_spec1(bc_t), w_spec1(lng_t), w_spec1(lnb_t),
                  w_spec1(gmean), w_spec1(dww_t), w_spec1(dwb_t)],
        out_specs=(pl.BlockSpec((Rt, GH), lambda t: (t, 0)),
                   pl.BlockSpec((8, GH), lambda t: (t, 0))),
        compiler_params=pltpu.CompilerParams(
            dimension_semantics=("parallel",),
            vmem_limit_bytes=vmem_limit),
    )(gx_p, cat_p, Wc_bd, bc_t, lng_t, lnb_t, gmean, dww_t, dwb_t)

    # ---- BatchNorm statistics combined host-side (tiny XLA reduce) ----
    stats = stats.reshape(nt, 8, GH)
    psum = stats[:, 0, :].reshape(nt, G, H).sum(axis=(0, 1))
    psq = stats[:, 1, :].reshape(nt, G, H).sum(axis=(0, 1))
    mean = psum / M
    var = psq / M - mean * mean
    bn_scale = params['bn_g'][0] * jax.lax.rsqrt(var + 1e-5)
    bn_shift = params['bn_b'][0] - mean * bn_scale
    sc_t = _tile_row(bn_scale[None, :], G)
    sh_t = _tile_row(bn_shift[None, :], G)
    pw_bd = _block_diag(params['pw_w'], G)
    pwb_t = _tile_row(params['pw_b'], G)

    # ---- kernel 1b ----
    tb = _pick_row_tile(Mp)
    nb = Mp // tb

    walk_flat_p = pl.pallas_call(
        _bn_pointwise_kernel,
        grid=(nb,),
        out_shape=jax.ShapeDtypeStruct((Mp, GH), f32),
        in_specs=[pl.BlockSpec((tb, GH), lambda t: (t, 0)),
                  w_spec1(sc_t), w_spec1(sh_t), w_spec1(pw_bd), w_spec1(pwb_t)],
        out_specs=pl.BlockSpec((tb, GH), lambda t: (t, 0)),
        compiler_params=pltpu.CompilerParams(
            dimension_semantics=("parallel",),
            vmem_limit_bytes=vmem_limit),
    )(acc_p, sc_t, sh_t, pw_bd, pwb_t)

    # free row-major reshape back to per-row layout; rows stay in the permuted
    # (quad, position, group) order, matching the permuted index arrays below.
    walk_flat = walk_flat_p.reshape(M, H)

    # ---- kernel 2 (node / edge aggregation + MLP + residual) ----
    def agg_proj(idx_flat, mask_flat, base, p):
        n = base.shape[0]
        valid = jnp.logical_not(mask_flat)
        # binary one-hot (validity folded in) is exact in bf16; 1/count is applied
        # AFTER accumulation inside the kernel, keeping the matmul exact.
        onehot = jnp.logical_and(
            jnp.equal(jnp.arange(n, dtype=idx_flat.dtype)[:, None], idx_flat[None, :]),
            valid[None, :]).astype(jnp.bfloat16)
        counts = jax.ops.segment_sum(valid.astype(f32), idx_flat, num_segments=n)
        inv_counts = (1.0 / jnp.maximum(counts, 1.0)).reshape(n, 1)

        tm = _pick_m_tile(M, n, vmem_limit)
        nmt = M // tm
        proj_w = (p['w1'], p['b1'], p['bn_g'], p['bn_b'], p['w2'], p['b2'])

        def w_spec2(a):
            return pl.BlockSpec(a.shape, lambda m: (0,) * a.ndim)

        return pl.pallas_call(
            _agg_mlp_kernel,
            grid=(nmt,),
            out_shape=jax.ShapeDtypeStruct((n, H), f32),
            in_specs=[pl.BlockSpec((n, tm), lambda m: (0, m)),
                      pl.BlockSpec((tm, H), lambda m: (m, 0)),
                      w_spec2(inv_counts), w_spec2(base)]
                     + [w_spec2(w) for w in proj_w],
            out_specs=pl.BlockSpec((n, H), lambda m: (0, 0)),
            scratch_shapes=[pltpu.VMEM((n, H), f32)],
            compiler_params=pltpu.CompilerParams(
                dimension_semantics=("arbitrary",),
                vmem_limit_bytes=vmem_limit),
        )(onehot, walk_flat, inv_counts, base.astype(f32), *proj_w)

    new_x = agg_proj(wni, wnm, x, params['node_proj'])
    new_e = agg_proj(wei, wem, edge_attr, params['edge_proj_out'])
    return new_x, new_e


# ---------------------------------------------------------------------------
# Pure-JAX reference (correctness check only; mirrors the PyTorch semantics)
# ---------------------------------------------------------------------------
def reference_forward(params, x, edge_attr, wni, wei, wnm, wem, wpe):
    f32 = jnp.float32
    Wn, L = wni.shape
    H = x.shape[-1]
    wx = jnp.where(wnm[:, :, None], 0.0, x[wni].astype(f32))
    we = jnp.where(wem[:, :, None], 0.0, edge_attr[wei].astype(f32))
    wx = wx + we @ params['We'] + params['be'][0]
    wx = wx + wpe.astype(f32) @ params['Wp'] + params['bp'][0]
    mean = wx.mean(-1, keepdims=True)
    var = ((wx - mean) ** 2).mean(-1, keepdims=True)
    wx = (wx - mean) / jnp.sqrt(var + 1e-5) * params['ln_g'][0] + params['ln_b'][0]

    K = params['dw_w'].shape[0]
    pad = K // 2
    xpad = jnp.pad(wx, ((0, 0), (pad, pad), (0, 0)))
    acc = jnp.zeros_like(wx)
    for k in range(K):
        acc = acc + xpad[:, k:k + L, :] * params['dw_w'][k]
    acc = acc + params['dw_b'][0]
    mean = acc.mean(axis=(0, 1), keepdims=True)
    var = ((acc - mean) ** 2).mean(axis=(0, 1), keepdims=True)
    h = (acc - mean) / jnp.sqrt(var + 1e-5) * params['bn_g'][0] + params['bn_b'][0]
    h = jnp.maximum(h, 0.0)
    h = jnp.maximum(h @ params['pw_w'] + params['pw_b'][0], 0.0)
    walk_flat = h.reshape(Wn * L, H)

    def agg_proj(idx, mask, base, p):
        n = base.shape[0]
        valid = (~mask).reshape(-1).astype(f32)
        idxf = idx.reshape(-1)
        sums = jax.ops.segment_sum(walk_flat * valid[:, None], idxf, num_segments=n)
        counts = jax.ops.segment_sum(valid, idxf, num_segments=n)
        agg = sums / jnp.maximum(counts, 1.0)[:, None]
        hh = agg @ p['w1'] + p['b1'][0]
        m = hh.mean(0, keepdims=True)
        v = ((hh - m) ** 2).mean(0, keepdims=True)
        hh = (hh - m) / jnp.sqrt(v + 1e-5) * p['bn_g'][0] + p['bn_b'][0]
        hh = jnp.maximum(hh, 0.0)
        return base.astype(f32) + hh @ p['w2'] + p['b2'][0]

    return (agg_proj(wni, wnm, x, params['node_proj']),
            agg_proj(wei, wem, edge_attr, params['edge_proj_out']))


# ---------------------------------------------------------------------------
# Deterministic synthetic parameter init (shapes from WalkEncoder.__init__,
# hidden_size=H, window_size=8 -> walk_pe_dim=15, d_conv=9, proj_mlp_ratio=1)
# ---------------------------------------------------------------------------
def init_params(key, H, P, K, r=1):
    ks = jax.random.split(key, 24)
    nrm = lambda k, s, sc=0.1: (sc * jax.random.normal(k, s)).astype(jnp.float32)

    def proj_params(keys):
        return {
            'w1': nrm(keys[0], (H, H * r)),
            'b1': nrm(keys[1], (1, H * r)),
            'bn_g': 1.0 + nrm(keys[2], (1, H * r)),
            'bn_b': nrm(keys[3], (1, H * r)),
            'w2': nrm(keys[4], (H * r, H)),
            'b2': nrm(keys[5], (1, H)),
        }

    return {
        'We': nrm(ks[0], (H, H)), 'be': nrm(ks[1], (1, H)),
        'Wp': nrm(ks[2], (P, H)), 'bp': nrm(ks[3], (1, H)),
        'ln_g': 1.0 + nrm(ks[4], (1, H)), 'ln_b': nrm(ks[5], (1, H)),
        'dw_w': nrm(ks[6], (K, H)), 'dw_b': nrm(ks[7], (1, H)),
        'bn_g': 1.0 + nrm(ks[8], (1, H)), 'bn_b': nrm(ks[9], (1, H)),
        'pw_w': nrm(ks[10], (H, H)), 'pw_b': nrm(ks[11], (1, H)),
        'node_proj': proj_params(ks[12:18]),
        'edge_proj_out': proj_params(ks[18:24]),
    }


if __name__ == "__main__":
    key = jax.random.PRNGKey(0)
    H, L, Wn, window, K = 32, 8, 8, 8, 9
    P = window * 2 - 1
    N, E = 16, 24

    ks = jax.random.split(key, 10)
    x = jax.random.normal(ks[0], (N, H), jnp.float32)
    edge_attr = jax.random.normal(ks[1], (E, H), jnp.float32)
    walk_node_idx = jax.random.randint(ks[2], (Wn, L), 0, N)
    walk_edge_idx = jax.random.randint(ks[3], (Wn, L), 0, E)
    walk_node_mask = jax.random.bernoulli(ks[4], 0.2, (Wn, L))
    walk_edge_mask = jax.random.bernoulli(ks[5], 0.25, (Wn, L))
    walk_pe = jax.random.normal(ks[6], (Wn, L, P), jnp.float32)
    params = init_params(ks[7], H, P, K)

    fwd = jax.jit(walk_encoder_forward)
    new_x, new_e = jax.block_until_ready(
        fwd(params, x, edge_attr, walk_node_idx, walk_edge_idx,
            walk_node_mask, walk_edge_mask, walk_pe))

    ref_x, ref_e = reference_forward(params, x, edge_attr, walk_node_idx, walk_edge_idx,
                                     walk_node_mask, walk_edge_mask, walk_pe)
    assert jnp.allclose(new_x, ref_x, atol=5e-3, rtol=5e-3), "node output mismatch"
    assert jnp.allclose(new_e, ref_e, atol=5e-3, rtol=5e-3), "edge output mismatch"

    print("KERNEL_OK")
</pallas_src>

<mosaic_0001>
module attributes {stable_mosaic.version = 11 : i64} {
  func.func private @main(%arg0: i32) attributes {dimension_semantics = [#tpu.dimension_semantics<core_parallel>], iteration_bounds = array<i64: 2>, tpu.core_type = #tpu.core_type<sc_scalar_subcore>, window_params = []} {
    return
  }
}

module attributes {stable_mosaic.version = 11 : i64} {
  func.func private @main(%arg0: i32) attributes {dimension_semantics = [#tpu.dimension_semantics<core_parallel>], iteration_bounds = array<i64: 2>, tpu.core_type = #tpu.core_type<sc_scalar_subcore>, window_params = []} {
    return
  }
}

module attributes {stable_mosaic.version = 11 : i64} {
  func.func @_walk_seq_kernel(%arg0: i32, %arg1: memref<16x128xf32, #tpu.memory_space<vmem>>, %arg2: memref<16x188xf32, #tpu.memory_space<vmem>>, %arg3: memref<188x128xf32, #tpu.memory_space<vmem>>, %arg4: memref<1x128xf32, #tpu.memory_space<vmem>>, %arg5: memref<1x128xf32, #tpu.memory_space<vmem>>, %arg6: memref<1x128xf32, #tpu.memory_space<vmem>>, %arg7: memref<128x128xf32, #tpu.memory_space<vmem>>, %arg8: memref<9x128xf32, #tpu.memory_space<vmem>>, %arg9: memref<1x128xf32, #tpu.memory_space<vmem>>, %arg10: memref<16x128xf32, #tpu.memory_space<vmem>>, %arg11: memref<8x128xf32, #tpu.memory_space<vmem>>) attributes {dimension_semantics = [#tpu.dimension_semantics<parallel>], iteration_bounds = array<i64: 1>, scalar_prefetch = 0 : i64, scratch_operands = 0 : i64, tpu.core_type = #tpu.core_type<tc>, window_params = [{transform_indices = @transform_0, window_bounds = array<i64: 16, 128>}, {transform_indices = @transform_1, window_bounds = array<i64: 16, 188>}, {pipeline_mode = #tpu.pipeline_mode<synchronous>, transform_indices = @transform_2, window_bounds = array<i64: 188, 128>}, {pipeline_mode = #tpu.pipeline_mode<synchronous>, transform_indices = @transform_3, window_bounds = array<i64: 1, 128>}, {pipeline_mode = #tpu.pipeline_mode<synchronous>, transform_indices = @transform_4, window_bounds = array<i64: 1, 128>}, {pipeline_mode = #tpu.pipeline_mode<synchronous>, transform_indices = @transform_5, window_bounds = array<i64: 1, 128>}, {pipeline_mode = #tpu.pipeline_mode<synchronous>, transform_indices = @transform_6, window_bounds = array<i64: 128, 128>}, {pipeline_mode = #tpu.pipeline_mode<synchronous>, transform_indices = @transform_7, window_bounds = array<i64: 9, 128>}, {pipeline_mode = #tpu.pipeline_mode<synchronous>, transform_indices = @transform_8, window_bounds = array<i64: 1, 128>}, {transform_indices = @transform_9, window_bounds = array<i64: 16, 128>}, {transform_indices = @transform_10, window_bounds = array<i64: 8, 128>}]} {
    %c0 = arith.constant 0 : index
    %c0_0 = arith.constant 0 : index
    %0 = vector.load %arg1[%c0, %c0_0] : memref<16x128xf32, #tpu.memory_space<vmem>>, vector<16x128xf32>
    %c0_1 = arith.constant 0 : index
    %c0_2 = arith.constant 0 : index
    %1 = vector.load %arg2[%c0_1, %c0_2] : memref<16x188xf32, #tpu.memory_space<vmem>>, vector<16x188xf32>
    %c0_3 = arith.constant 0 : index
    %c0_4 = arith.constant 0 : index
    %2 = vector.load %arg3[%c0_3, %c0_4] : memref<188x128xf32, #tpu.memory_space<vmem>>, vector<188x128xf32>
    %cst = arith.constant dense<0.000000e+00> : vector<16x128xf32>
    %3 = tpu.matmul %1, %2, %cst {dimension_numbers = #tpu.dot_dimension_numbers<[1], [0], [0], [1], [0, 0, 1, 1], [], []>} : vector<16x188xf32>, vector<188x128xf32>, vector<16x128xf32> -> vector<16x128xf32>
    %4 = arith.addf %0, %3 : vector<16x128xf32>
    %c0_5 = arith.constant 0 : index
    %c0_6 = arith.constant 0 : index
    %5 = vector.load %arg4[%c0_5, %c0_6] : memref<1x128xf32, #tpu.memory_space<vmem>>, vector<1x128xf32>
    %6 = vector.broadcast %5 : vector<1x128xf32> to vector<16x128xf32>
    %7 = arith.addf %4, %6 : vector<16x128xf32>
    %c0_7 = arith.constant 0 : index
    %c0_8 = arith.constant 0 : index
    %8 = vector.load %arg7[%c0_7, %c0_8] : memref<128x128xf32, #tpu.memory_space<vmem>>, vector<128x128xf32>
    %cst_9 = arith.constant dense<0.000000e+00> : vector<16x128xf32>
    %9 = tpu.matmul %7, %8, %cst_9 {dimension_numbers = #tpu.dot_dimension_numbers<[1], [0], [0], [1], [0, 0, 1, 1], [], []>} : vector<16x128xf32>, vector<128x128xf32>, vector<16x128xf32> -> vector<16x128xf32>
    %10 = arith.subf %7, %9 : vector<16x128xf32>
    %11 = arith.mulf %10, %10 : vector<16x128xf32>
    %cst_10 = arith.constant dense<0.000000e+00> : vector<16x128xf32>
    %12 = tpu.matmul %11, %8, %cst_10 {dimension_numbers = #tpu.dot_dimension_numbers<[1], [0], [0], [1], [0, 0, 1, 1], [], []>} : vector<16x128xf32>, vector<128x128xf32>, vector<16x128xf32> -> vector<16x128xf32>
    %cst_11 = arith.constant 9.99999974E-6 : f32
    %13 = vector.broadcast %cst_11 : f32 to vector<16x128xf32>
    %14 = arith.addf %12, %13 : vector<16x128xf32>
    %15 = math.rsqrt %14 : vector<16x128xf32>
    %16 = arith.mulf %10, %15 : vector<16x128xf32>
    %c0_12 = arith.constant 0 : index
    %c0_13 = arith.constant 0 : index
    %17 = vector.load %arg5[%c0_12, %c0_13] : memref<1x128xf32, #tpu.memory_space<vmem>>, vector<1x128xf32>
    %18 = vector.broadcast %17 : vector<1x128xf32> to vector<16x128xf32>
    %19 = arith.mulf %16, %18 : vector<16x128xf32>
    %c0_14 = arith.constant 0 : index
    %c0_15 = arith.constant 0 : index
    %20 = vector.load %arg6[%c0_14, %c0_15] : memref<1x128xf32, #tpu.memory_space<vmem>>, vector<1x128xf32>
    %21 = vector.broadcast %20 : vector<1x128xf32> to vector<16x128xf32>
    %22 = arith.addf %19, %21 : vector<16x128xf32>
    %23 = tpu.iota {dimensions = array<i32: 0>} : vector<16x1xi32>
    %c8_i32 = arith.constant 8 : i32
    %c0_i32 = arith.constant 0 : i32
    %24 = arith.cmpi eq, %c8_i32, %c0_i32 : i32
    %c1_i32 = arith.constant 1 : i32
    %25 = arith.select %24, %c1_i32, %c8_i32 : i32
    %26 = vector.broadcast %25 : i32 to vector<16x1xi32>
    %27 = arith.remsi %23, %26 : vector<16x1xi32>
    %c0_i32_16 = arith.constant 0 : i32
    %28 = vector.broadcast %c0_i32_16 : i32 to vector<16x1xi32>
    %29 = arith.cmpi ne, %27, %28 : vector<16x1xi32>
    %c0_i32_17 = arith.constant 0 : i32
    %30 = vector.broadcast %c0_i32_17 : i32 to vector<16x1xi32>
    %31 = arith.cmpi slt, %27, %30 : vector<16x1xi32>
    %c0_i32_18 = arith.constant 0 : i32
    %32 = arith.cmpi slt, %25, %c0_i32_18 : i32
    %33 = vector.broadcast %32 : i1 to vector<16x1xi1>
    %34 = vector.broadcast %33 : vector<16x1xi1> to vector<16x1xi1>
    %35 = arith.xori %31, %34 : vector<16x1xi1>
    %36 = arith.andi %35, %29 : vector<16x1xi1>
    %37 = vector.broadcast %25 : i32 to vector<16x1xi32>
    %38 = arith.addi %27, %37 : vector<16x1xi32>
    %39 = arith.select %36, %38, %27 : vector<16x1xi1>, vector<16x1xi32>
    %c0_19 = arith.constant 0 : index
    %c0_20 = arith.constant 0 : index
    %40 = vector.load %arg8[%c0_19, %c0_20] : memref<9x128xf32, #tpu.memory_space<vmem>>, vector<9x128xf32>
    %41 = vector.extract_strided_slice %40 {offsets = [4, 0], sizes = [1, 128], strides = [1, 1]} : vector<9x128xf32> to vector<1x128xf32>
    %42 = vector.broadcast %41 : vector<1x128xf32> to vector<16x128xf32>
    %43 = arith.mulf %22, %42 : vector<16x128xf32>
    %c4_i32 = arith.constant 4 : i32
    %44 = tpu.dynamic_rotate %22 by %c4_i32 dim 0 : vector<16x128xf32>, i32 -> vector<16x128xf32>
    %c-4_i32 = arith.constant -4 : i32
    %45 = vector.broadcast %c-4_i32 : i32 to vector<16x1xi32>
    %46 = arith.addi %39, %45 : vector<16x1xi32>
    %c0_i32_21 = arith.constant 0 : i32
    %47 = vector.broadcast %c0_i32_21 : i32 to vector<16x1xi32>
    %48 = arith.cmpi sge, %46, %47 : vector<16x1xi32>
    %c-4_i32_22 = arith.constant -4 : i32
    %49 = vector.broadcast %c-4_i32_22 : i32 to vector<16x1xi32>
    %50 = arith.addi %39, %49 : vector<16x1xi32>
    %c7_i32 = arith.constant 7 : i32
    %51 = vector.broadcast %c7_i32 : i32 to vector<16x1xi32>
    %52 = arith.cmpi sle, %50, %51 : vector<16x1xi32>
    %53 = arith.andi %48, %52 : vector<16x1xi1>
    %cst_23 = arith.constant 0.000000e+00 : f32
    %54 = vector.shape_cast %53 : vector<16x1xi1> to vector<16x1xi1>
    %55 = vector.broadcast %54 : vector<16x1xi1> to vector<16x128xi1>
    %56 = vector.broadcast %cst_23 : f32 to vector<16x128xf32>
    %57 = arith.select %55, %44, %56 : vector<16x128xi1>, vector<16x128xf32>
    %58 = vector.extract_strided_slice %40 {offsets = [0, 0], sizes = [1, 128], strides = [1, 1]} : vector<9x128xf32> to vector<1x128xf32>
    %59 = vector.broadcast %58 : vector<1x128xf32> to vector<16x128xf32>
    %60 = arith.mulf %57, %59 : vector<16x128xf32>
    %61 = arith.addf %43, %60 : vector<16x128xf32>
    %c3_i32 = arith.constant 3 : i32
    %62 = tpu.dynamic_rotate %22 by %c3_i32 dim 0 : vector<16x128xf32>, i32 -> vector<16x128xf32>
    %c-3_i32 = arith.constant -3 : i32
    %63 = vector.broadcast %c-3_i32 : i32 to vector<16x1xi32>
    %64 = arith.addi %39, %63 : vector<16x1xi32>
    %c0_i32_24 = arith.constant 0 : i32
    %65 = vector.broadcast %c0_i32_24 : i32 to vector<16x1xi32>
    %66 = arith.cmpi sge, %64, %65 : vector<16x1xi32>
    %c-3_i32_25 = arith.constant -3 : i32
    %67 = vector.broadcast %c-3_i32_25 : i32 to vector<16x1xi32>
    %68 = arith.addi %39, %67 : vector<16x1xi32>
    %c7_i32_26 = arith.constant 7 : i32
    %69 = vector.broadcast %c7_i32_26 : i32 to vector<16x1xi32>
    %70 = arith.cmpi sle, %68, %69 : vector<16x1xi32>
    %71 = arith.andi %66, %70 : vector<16x1xi1>
    %cst_27 = arith.constant 0.000000e+00 : f32
    %72 = vector.shape_cast %71 : vector<16x1xi1> to vector<16x1xi1>
    %73 = vector.broadcast %72 : vector<16x1xi1> to vector<16x128xi1>
    %74 = vector.broadcast %cst_27 : f32 to vector<16x128xf32>
    %75 = arith.select %73, %62, %74 : vector<16x128xi1>, vector<16x128xf32>
    %76 = vector.extract_strided_slice %40 {offsets = [1, 0], sizes = [1, 128], strides = [1, 1]} : vector<9x128xf32> to vector<1x128xf32>
    %77 = vector.broadcast %76 : vector<1x128xf32> to vector<16x128xf32>
    %78 = arith.mulf %75, %77 : vector<16x128xf32>
    %79 = arith.addf %61, %78 : vector<16x128xf32>
    %c2_i32 = arith.constant 2 : i32
    %80 = tpu.dynamic_rotate %22 by %c2_i32 dim 0 : vector<16x128xf32>, i32 -> vector<16x128xf32>
    %c-2_i32 = arith.constant -2 : i32
    %81 = vector.broadcast %c-2_i32 : i32 to vector<16x1xi32>
    %82 = arith.addi %39, %81 : vector<16x1xi32>
    %c0_i32_28 = arith.constant 0 : i32
    %83 = vector.broadcast %c0_i32_28 : i32 to vector<16x1xi32>
    %84 = arith.cmpi sge, %82, %83 : vector<16x1xi32>
    %c-2_i32_29 = arith.constant -2 : i32
    %85 = vector.broadcast %c-2_i32_29 : i32 to vector<16x1xi32>
    %86 = arith.addi %39, %85 : vector<16x1xi32>
    %c7_i32_30 = arith.constant 7 : i32
    %87 = vector.broadcast %c7_i32_30 : i32 to vector<16x1xi32>
    %88 = arith.cmpi sle, %86, %87 : vector<16x1xi32>
    %89 = arith.andi %84, %88 : vector<16x1xi1>
    %cst_31 = arith.constant 0.000000e+00 : f32
    %90 = vector.shape_cast %89 : vector<16x1xi1> to vector<16x1xi1>
    %91 = vector.broadcast %90 : vector<16x1xi1> to vector<16x128xi1>
    %92 = vector.broadcast %cst_31 : f32 to vector<16x128xf32>
    %93 = arith.select %91, %80, %92 : vector<16x128xi1>, vector<16x128xf32>
    %94 = vector.extract_strided_slice %40 {offsets = [2, 0], sizes = [1, 128], strides = [1, 1]} : vector<9x128xf32> to vector<1x128xf32>
    %95 = vector.broadcast %94 : vector<1x128xf32> to vector<16x128xf32>
    %96 = arith.mulf %93, %95 : vector<16x128xf32>
    %97 = arith.addf %79, %96 : vector<16x128xf32>
    %c1_i32_32 = arith.constant 1 : i32
    %98 = tpu.dynamic_rotate %22 by %c1_i32_32 dim 0 : vector<16x128xf32>, i32 -> vector<16x128xf32>
    %c-1_i32 = arith.constant -1 : i32
    %99 = vector.broadcast %c-1_i32 : i32 to vector<16x1xi32>
    %100 = arith.addi %39, %99 : vector<16x1xi32>
    %c0_i32_33 = arith.constant 0 : i32
    %101 = vector.broadcast %c0_i32_33 : i32 to vector<16x1xi32>
    %102 = arith.cmpi sge, %100, %101 : vector<16x1xi32>
    %c-1_i32_34 = arith.constant -1 : i32
    %103 = vector.broadcast %c-1_i32_34 : i32 to vector<16x1xi32>
    %104 = arith.addi %39, %103 : vector<16x1xi32>
    %c7_i32_35 = arith.constant 7 : i32
    %105 = vector.broadcast %c7_i32_35 : i32 to vector<16x1xi32>
    %106 = arith.cmpi sle, %104, %105 : vector<16x1xi32>
    %107 = arith.andi %102, %106 : vector<16x1xi1>
    %cst_36 = arith.constant 0.000000e+00 : f32
    %108 = vector.shape_cast %107 : vector<16x1xi1> to vector<16x1xi1>
    %109 = vector.broadcast %108 : vector<16x1xi1> to vector<16x128xi1>
    %110 = vector.broadcast %cst_36 : f32 to vector<16x128xf32>
    %111 = arith.select %109, %98, %110 : vector<16x128xi1>, vector<16x128xf32>
    %112 = vector.extract_strided_slice %40 {offsets = [3, 0], sizes = [1, 128], strides = [1, 1]} : vector<9x128xf32> to vector<1x128xf32>
    %113 = vector.broadcast %112 : vector<1x128xf32> to vector<16x128xf32>
    %114 = arith.mulf %111, %113 : vector<16x128xf32>
    %115 = arith.addf %97, %114 : vector<16x128xf32>
    %c15_i32 = arith.constant 15 : i32
    %116 = tpu.dynamic_rotate %22 by %c15_i32 dim 0 : vector<16x128xf32>, i32 -> vector<16x128xf32>
    %c1_i32_37 = arith.constant 1 : i32
    %117 = vector.broadcast %c1_i32_37 : i32 to vector<16x1xi32>
    %118 = arith.addi %39, %117 : vector<16x1xi32>
    %c0_i32_38 = arith.constant 0 : i32
    %119 = vector.broadcast %c0_i32_38 : i32 to vector<16x1xi32>
    %120 = arith.cmpi sge, %118, %119 : vector<16x1xi32>
    %c1_i32_39 = arith.constant 1 : i32
    %121 = vector.broadcast %c1_i32_39 : i32 to vector<16x1xi32>
    %122 = arith.addi %39, %121 : vector<16x1xi32>
    %c7_i32_40 = arith.constant 7 : i32
    %123 = vector.broadcast %c7_i32_40 : i32 to vector<16x1xi32>
    %124 = arith.cmpi sle, %122, %123 : vector<16x1xi32>
    %125 = arith.andi %120, %124 : vector<16x1xi1>
    %cst_41 = arith.constant 0.000000e+00 : f32
    %126 = vector.shape_cast %125 : vector<16x1xi1> to vector<16x1xi1>
    %127 = vector.broadcast %126 : vector<16x1xi1> to vector<16x128xi1>
    %128 = vector.broadcast %cst_41 : f32 to vector<16x128xf32>
    %129 = arith.select %127, %116, %128 : vector<16x128xi1>, vector<16x128xf32>
    %130 = vector.extract_strided_slice %40 {offsets = [5, 0], sizes = [1, 128], strides = [1, 1]} : vector<9x128xf32> to vector<1x128xf32>
    %131 = vector.broadcast %130 : vector<1x128xf32> to vector<16x128xf32>
    %132 = arith.mulf %129, %131 : vector<16x128xf32>
    %133 = arith.addf %115, %132 : vector<16x128xf32>
    %c14_i32 = arith.constant 14 : i32
    %134 = tpu.dynamic_rotate %22 by %c14_i32 dim 0 : vector<16x128xf32>, i32 -> vector<16x128xf32>
    %c2_i32_42 = arith.constant 2 : i32
    %135 = vector.broadcast %c2_i32_42 : i32 to vector<16x1xi32>
    %136 = arith.addi %39, %135 : vector<16x1xi32>
    %c0_i32_43 = arith.constant 0 : i32
    %137 = vector.broadcast %c0_i32_43 : i32 to vector<16x1xi32>
    %138 = arith.cmpi sge, %136, %137 : vector<16x1xi32>
    %c2_i32_44 = arith.constant 2 : i32
    %139 = vector.broadcast %c2_i32_44 : i32 to vector<16x1xi32>
    %140 = arith.addi %39, %139 : vector<16x1xi32>
    %c7_i32_45 = arith.constant 7 : i32
    %141 = vector.broadcast %c7_i32_45 : i32 to vector<16x1xi32>
    %142 = arith.cmpi sle, %140, %141 : vector<16x1xi32>
    %143 = arith.andi %138, %142 : vector<16x1xi1>
    %cst_46 = arith.constant 0.000000e+00 : f32
    %144 = vector.shape_cast %143 : vector<16x1xi1> to vector<16x1xi1>
    %145 = vector.broadcast %144 : vector<16x1xi1> to vector<16x128xi1>
    %146 = vector.broadcast %cst_46 : f32 to vector<16x128xf32>
    %147 = arith.select %145, %134, %146 : vector<16x128xi1>, vector<16x128xf32>
    %148 = vector.extract_strided_slice %40 {offsets = [6, 0], sizes = [1, 128], strides = [1, 1]} : vector<9x128xf32> to vector<1x128xf32>
    %149 = vector.broadcast %148 : vector<1x128xf32> to vector<16x128xf32>
    %150 = arith.mulf %147, %149 : vector<16x128xf32>
    %151 = arith.addf %133, %150 : vector<16x128xf32>
    %c13_i32 = arith.constant 13 : i32
    %152 = tpu.dynamic_rotate %22 by %c13_i32 dim 0 : vector<16x128xf32>, i32 -> vector<16x128xf32>
    %c3_i32_47 = arith.constant 3 : i32
    %153 = vector.broadcast %c3_i32_47 : i32 to vector<16x1xi32>
    %154 = arith.addi %39, %153 : vector<16x1xi32>
    %c0_i32_48 = arith.constant 0 : i32
    %155 = vector.broadcast %c0_i32_48 : i32 to vector<16x1xi32>
    %156 = arith.cmpi sge, %154, %155 : vector<16x1xi32>
    %c3_i32_49 = arith.constant 3 : i32
    %157 = vector.broadcast %c3_i32_49 : i32 to vector<16x1xi32>
    %158 = arith.addi %39, %157 : vector<16x1xi32>
    %c7_i32_50 = arith.constant 7 : i32
    %159 = vector.broadcast %c7_i32_50 : i32 to vector<16x1xi32>
    %160 = arith.cmpi sle, %158, %159 : vector<16x1xi32>
    %161 = arith.andi %156, %160 : vector<16x1xi1>
    %cst_51 = arith.constant 0.000000e+00 : f32
    %162 = vector.shape_cast %161 : vector<16x1xi1> to vector<16x1xi1>
    %163 = vector.broadcast %162 : vector<16x1xi1> to vector<16x128xi1>
    %164 = vector.broadcast %cst_51 : f32 to vector<16x128xf32>
    %165 = arith.select %163, %152, %164 : vector<16x128xi1>, vector<16x128xf32>
    %166 = vector.extract_strided_slice %40 {offsets = [7, 0], sizes = [1, 128], strides = [1, 1]} : vector<9x128xf32> to vector<1x128xf32>
    %167 = vector.broadcast %166 : vector<1x128xf32> to vector<16x128xf32>
    %168 = arith.mulf %165, %167 : vector<16x128xf32>
    %169 = arith.addf %151, %168 : vector<16x128xf32>
    %c12_i32 = arith.constant 12 : i32
    %170 = tpu.dynamic_rotate %22 by %c12_i32 dim 0 : vector<16x128xf32>, i32 -> vector<16x128xf32>
    %c4_i32_52 = arith.constant 4 : i32
    %171 = vector.broadcast %c4_i32_52 : i32 to vector<16x1xi32>
    %172 = arith.addi %39, %171 : vector<16x1xi32>
    %c0_i32_53 = arith.constant 0 : i32
    %173 = vector.broadcast %c0_i32_53 : i32 to vector<16x1xi32>
    %174 = arith.cmpi sge, %172, %173 : vector<16x1xi32>
    %c4_i32_54 = arith.constant 4 : i32
    %175 = vector.broadcast %c4_i32_54 : i32 to vector<16x1xi32>
    %176 = arith.addi %39, %175 : vector<16x1xi32>
    %c7_i32_55 = arith.constant 7 : i32
    %177 = vector.broadcast %c7_i32_55 : i32 to vector<16x1xi32>
    %178 = arith.cmpi sle, %176, %177 : vector<16x1xi32>
    %179 = arith.andi %174, %178 : vector<16x1xi1>
    %cst_56 = arith.constant 0.000000e+00 : f32
    %180 = vector.shape_cast %179 : vector<16x1xi1> to vector<16x1xi1>
    %181 = vector.broadcast %180 : vector<16x1xi1> to vector<16x128xi1>
    %182 = vector.broadcast %cst_56 : f32 to vector<16x128xf32>
    %183 = arith.select %181, %170, %182 : vector<16x128xi1>, vector<16x128xf32>
    %184 = vector.extract_strided_slice %40 {offsets = [8, 0], sizes = [1, 128], strides = [1, 1]} : vector<9x128xf32> to vector<1x128xf32>
    %185 = vector.broadcast %184 : vector<1x128xf32> to vector<16x128xf32>
    %186 = arith.mulf %183, %185 : vector<16x128xf32>
    %187 = arith.addf %169, %186 : vector<16x128xf32>
    %c0_57 = arith.constant 0 : index
    %c0_58 = arith.constant 0 : index
    %188 = vector.load %arg9[%c0_57, %c0_58] : memref<1x128xf32, #tpu.memory_space<vmem>>, vector<1x128xf32>
    %189 = vector.broadcast %188 : vector<1x128xf32> to vector<16x128xf32>
    %190 = arith.addf %187, %189 : vector<16x128xf32>
    %c0_59 = arith.constant 0 : index
    %c0_60 = arith.constant 0 : index
    %191 = vector.load %arg10[%c0_59, %c0_60] : memref<16x128xf32, #tpu.memory_space<vmem>>, vector<16x128xf32>
    tpu.vector_store %arg10[%c0_59, %c0_60], %190 {strides = array<i32>} : memref<16x128xf32, #tpu.memory_space<vmem>>, vector<16x128xf32>,
    %cst_61 = arith.constant 0.000000e+00 : f32
    %192 = vector.broadcast %cst_61 : f32 to vector<8x128xf32>
    %c0_62 = arith.constant 0 : index
    %c0_63 = arith.constant 0 : index
    %193 = vector.load %arg11[%c0_62, %c0_63] : memref<8x128xf32, #tpu.memory_space<vmem>>, vector<8x128xf32>
    tpu.vector_store %arg11[%c0_62, %c0_63], %192 {strides = array<i32>} : memref<8x128xf32, #tpu.memory_space<vmem>>, vector<8x128xf32>,
    %cst_64 = arith.constant dense<0.000000e+00> : vector<128xf32>
    %194 = vector.multi_reduction <add>, %190, %cst_64 [0] : vector<16x128xf32> to vector<128xf32>
    %195 = vector.shape_cast %194 : vector<128xf32> to vector<1x128xf32>
    %c0_65 = arith.constant 0 : index
    %c0_66 = arith.constant 0 : index
    %196 = vector.load %arg11[%c0_65, %c0_66] : memref<8x128xf32, #tpu.memory_space<vmem>>, vector<1x128xf32>
    tpu.vector_store %arg11[%c0_65, %c0_66], %195 {strides = array<i32>} : memref<8x128xf32, #tpu.memory_space<vmem>>, vector<1x128xf32>,
    %197 = arith.mulf %190, %190 : vector<16x128xf32>
    %cst_67 = arith.constant dense<0.000000e+00> : vector<128xf32>
    %198 = vector.multi_reduction <add>, %197, %cst_67 [0] : vector<16x128xf32> to vector<128xf32>
    %199 = vector.shape_cast %198 : vector<128xf32> to vector<1x128xf32>
    %c1 = arith.constant 1 : index
    %c0_68 = arith.constant 0 : index
    %200 = vector.load %arg11[%c1, %c0_68] : memref<8x128xf32, #tpu.memory_space<vmem>>, vector<1x128xf32>
    tpu.vector_store %arg11[%c1, %c0_68], %199 {strides = array<i32>} : memref<8x128xf32, #tpu.memory_space<vmem>>, vector<1x128xf32>,
    return
  }
  func.func @transform_0(%arg0: i32) -> (i32, i32) {
    %c0_i32 = arith.constant 0 : i32
    %c0_i32_0 = arith.constant 0 : i32
    return %arg0, %c0_i32 : i32, i32
  }
  func.func @transform_1(%arg0: i32) -> (i32, i32) {
    %c0_i32 = arith.constant 0 : i32
    %c0_i32_0 = arith.constant 0 : i32
    return %arg0, %c0_i32 : i32, i32
  }
  func.func @transform_2(%arg0: i32) -> (i32, i32) {
    %c0_i32 = arith.constant 0 : i32
    %c0_i32_0 = arith.constant 0 : i32
    %c0_i32_1 = arith.constant 0 : i32
    return %c0_i32, %c0_i32_0 : i32, i32
  }
  func.func @transform_3(%arg0: i32) -> (i32, i32) {
    %c0_i32 = arith.constant 0 : i32
    %c0_i32_0 = arith.constant 0 : i32
    %c0_i32_1 = arith.constant 0 : i32
    return %c0_i32, %c0_i32_0 : i32, i32
  }
  func.func @transform_4(%arg0: i32) -> (i32, i32) {
    %c0_i32 = arith.constant 0 : i32
    %c0_i32_0 = arith.constant 0 : i32
    %c0_i32_1 = arith.constant 0 : i32
    return %c0_i32, %c0_i32_0 : i32, i32
  }
  func.func @transform_5(%arg0: i32) -> (i32, i32) {
    %c0_i32 = arith.constant 0 : i32
    %c0_i32_0 = arith.constant 0 : i32
    %c0_i32_1 = arith.constant 0 : i32
    return %c0_i32, %c0_i32_0 : i32, i32
  }
  func.func @transform_6(%arg0: i32) -> (i32, i32) {
    %c0_i32 = arith.constant 0 : i32
    %c0_i32_0 = arith.constant 0 : i32
    %c0_i32_1 = arith.constant 0 : i32
    return %c0_i32, %c0_i32_0 : i32, i32
  }
  func.func @transform_7(%arg0: i32) -> (i32, i32) {
    %c0_i32 = arith.constant 0 : i32
    %c0_i32_0 = arith.constant 0 : i32
    %c0_i32_1 = arith.constant 0 : i32
    return %c0_i32, %c0_i32_0 : i32, i32
  }
  func.func @transform_8(%arg0: i32) -> (i32, i32) {
    %c0_i32 = arith.constant 0 : i32
    %c0_i32_0 = arith.constant 0 : i32
    %c0_i32_1 = arith.constant 0 : i32
    return %c0_i32, %c0_i32_0 : i32, i32
  }
  func.func @transform_9(%arg0: i32) -> (i32, i32) {
    %c0_i32 = arith.constant 0 : i32
    %c0_i32_0 = arith.constant 0 : i32
    return %arg0, %c0_i32 : i32, i32
  }
  func.func @transform_10(%arg0: i32) -> (i32, i32) {
    %c0_i32 = arith.constant 0 : i32
    %c0_i32_0 = arith.constant 0 : i32
    return %arg0, %c0_i32 : i32, i32
  }
}

module attributes {stable_mosaic.version = 11 : i64} {
  func.func @_bn_pointwise_kernel(%arg0: i32, %arg1: memref<16x128xf32, #tpu.memory_space<vmem>>, %arg2: memref<1x128xf32, #tpu.memory_space<vmem>>, %arg3: memref<1x128xf32, #tpu.memory_space<vmem>>, %arg4: memref<128x128xf32, #tpu.memory_space<vmem>>, %arg5: memref<1x128xf32, #tpu.memory_space<vmem>>, %arg6: memref<16x128xf32, #tpu.memory_space<vmem>>) attributes {dimension_semantics = [#tpu.dimension_semantics<parallel>], iteration_bounds = array<i64: 1>, scalar_prefetch = 0 : i64, scratch_operands = 0 : i64, tpu.core_type = #tpu.core_type<tc>, window_params = [{transform_indices = @transform_0, window_bounds = array<i64: 16, 128>}, {pipeline_mode = #tpu.pipeline_mode<synchronous>, transform_indices = @transform_1, window_bounds = array<i64: 1, 128>}, {pipeline_mode = #tpu.pipeline_mode<synchronous>, transform_indices = @transform_2, window_bounds = array<i64: 1, 128>}, {pipeline_mode = #tpu.pipeline_mode<synchronous>, transform_indices = @transform_3, window_bounds = array<i64: 128, 128>}, {pipeline_mode = #tpu.pipeline_mode<synchronous>, transform_indices = @transform_4, window_bounds = array<i64: 1, 128>}, {transform_indices = @transform_5, window_bounds = array<i64: 16, 128>}]} {
    %c0 = arith.constant 0 : index
    %c0_0 = arith.constant 0 : index
    %0 = vector.load %arg1[%c0, %c0_0] : memref<16x128xf32, #tpu.memory_space<vmem>>, vector<16x128xf32>
    %c0_1 = arith.constant 0 : index
    %c0_2 = arith.constant 0 : index
    %1 = vector.load %arg2[%c0_1, %c0_2] : memref<1x128xf32, #tpu.memory_space<vmem>>, vector<1x128xf32>
    %2 = vector.broadcast %1 : vector<1x128xf32> to vector<16x128xf32>
    %3 = arith.mulf %0, %2 : vector<16x128xf32>
    %c0_3 = arith.constant 0 : index
    %c0_4 = arith.constant 0 : index
    %4 = vector.load %arg3[%c0_3, %c0_4] : memref<1x128xf32, #tpu.memory_space<vmem>>, vector<1x128xf32>
    %5 = vector.broadcast %4 : vector<1x128xf32> to vector<16x128xf32>
    %6 = arith.addf %3, %5 : vector<16x128xf32>
    %cst = arith.constant 0.000000e+00 : f32
    %7 = vector.broadcast %cst : f32 to vector<16x128xf32>
    %8 = arith.maximumf %6, %7 : vector<16x128xf32>
    %c0_5 = arith.constant 0 : index
    %c0_6 = arith.constant 0 : index
    %9 = vector.load %arg4[%c0_5, %c0_6] : memref<128x128xf32, #tpu.memory_space<vmem>>, vector<128x128xf32>
    %cst_7 = arith.constant dense<0.000000e+00> : vector<16x128xf32>
    %10 = tpu.matmul %8, %9, %cst_7 {dimension_numbers = #tpu.dot_dimension_numbers<[1], [0], [0], [1], [0, 0, 1, 1], [], []>} : vector<16x128xf32>, vector<128x128xf32>, vector<16x128xf32> -> vector<16x128xf32>
    %c0_8 = arith.constant 0 : index
    %c0_9 = arith.constant 0 : index
    %11 = vector.load %arg5[%c0_8, %c0_9] : memref<1x128xf32, #tpu.memory_space<vmem>>, vector<1x128xf32>
    %12 = vector.broadcast %11 : vector<1x128xf32> to vector<16x128xf32>
    %13 = arith.addf %10, %12 : vector<16x128xf32>
    %cst_10 = arith.constant 0.000000e+00 : f32
    %14 = vector.broadcast %cst_10 : f32 to vector<16x128xf32>
    %15 = arith.maximumf %13, %14 : vector<16x128xf32>
    %c0_11 = arith.constant 0 : index
    %c0_12 = arith.constant 0 : index
    %16 = vector.load %arg6[%c0_11, %c0_12] : memref<16x128xf32, #tpu.memory_space<vmem>>, vector<16x128xf32>
    tpu.vector_store %arg6[%c0_11, %c0_12], %15 {strides = array<i32>} : memref<16x128xf32, #tpu.memory_space<vmem>>, vector<16x128xf32>,
    return
  }
  func.func @transform_0(%arg0: i32) -> (i32, i32) {
    %c0_i32 = arith.constant 0 : i32
    %c0_i32_0 = arith.constant 0 : i32
    return %arg0, %c0_i32 : i32, i32
  }
  func.func @transform_1(%arg0: i32) -> (i32, i32) {
    %c0_i32 = arith.constant 0 : i32
    %c0_i32_0 = arith.constant 0 : i32
    %c0_i32_1 = arith.constant 0 : i32
    return %c0_i32, %c0_i32_0 : i32, i32
  }
  func.func @transform_2(%arg0: i32) -> (i32, i32) {
    %c0_i32 = arith.constant 0 : i32
    %c0_i32_0 = arith.constant 0 : i32
    %c0_i32_1 = arith.constant 0 : i32
    return %c0_i32, %c0_i32_0 : i32, i32
  }
  func.func @transform_3(%arg0: i32) -> (i32, i32) {
    %c0_i32 = arith.constant 0 : i32
    %c0_i32_0 = arith.constant 0 : i32
    %c0_i32_1 = arith.constant 0 : i32
    return %c0_i32, %c0_i32_0 : i32, i32
  }
  func.func @transform_4(%arg0: i32) -> (i32, i32) {
    %c0_i32 = arith.constant 0 : i32
    %c0_i32_0 = arith.constant 0 : i32
    %c0_i32_1 = arith.constant 0 : i32
    return %c0_i32, %c0_i32_0 : i32, i32
  }
  func.func @transform_5(%arg0: i32) -> (i32, i32) {
    %c0_i32 = arith.constant 0 : i32
    %c0_i32_0 = arith.constant 0 : i32
    return %arg0, %c0_i32 : i32, i32
  }
}

module attributes {stable_mosaic.version = 11 : i64} {
  func.func @_agg_mlp_kernel(%arg0: i32, %arg1: memref<16x64xbf16, #tpu.memory_space<vmem>>, %arg2: memref<64x32xf32, #tpu.memory_space<vmem>>, %arg3: memref<16x1xf32, #tpu.memory_space<vmem>>, %arg4: memref<16x32xf32, #tpu.memory_space<vmem>>, %arg5: memref<32x32xf32, #tpu.memory_space<vmem>>, %arg6: memref<1x32xf32, #tpu.memory_space<vmem>>, %arg7: memref<1x32xf32, #tpu.memory_space<vmem>>, %arg8: memref<1x32xf32, #tpu.memory_space<vmem>>, %arg9: memref<32x32xf32, #tpu.memory_space<vmem>>, %arg10: memref<1x32xf32, #tpu.memory_space<vmem>>, %arg11: memref<16x32xf32, #tpu.memory_space<vmem>>, %arg12: memref<16x32xf32, #tpu.memory_space<vmem>>) attributes {dimension_semantics = [#tpu.dimension_semantics<arbitrary>], iteration_bounds = array<i64: 1>, scalar_prefetch = 0 : i64, scratch_operands = 1 : i64, tpu.core_type = #tpu.core_type<tc>, window_params = [{transform_indices = @transform_0, window_bounds = array<i64: 16, 64>}, {transform_indices = @transform_1, window_bounds = array<i64: 64, 32>}, {pipeline_mode = #tpu.pipeline_mode<synchronous>, transform_indices = @transform_2, window_bounds = array<i64: 16, 1>}, {pipeline_mode = #tpu.pipeline_mode<synchronous>, transform_indices = @transform_3, window_bounds = array<i64: 16, 32>}, {pipeline_mode = #tpu.pipeline_mode<synchronous>, transform_indices = @transform_4, window_bounds = array<i64: 32, 32>}, {pipeline_mode = #tpu.pipeline_mode<synchronous>, transform_indices = @transform_5, window_bounds = array<i64: 1, 32>}, {pipeline_mode = #tpu.pipeline_mode<synchronous>, transform_indices = @transform_6, window_bounds = array<i64: 1, 32>}, {pipeline_mode = #tpu.pipeline_mode<synchronous>, transform_indices = @transform_7, window_bounds = array<i64: 1, 32>}, {pipeline_mode = #tpu.pipeline_mode<synchronous>, transform_indices = @transform_8, window_bounds = array<i64: 32, 32>}, {pipeline_mode = #tpu.pipeline_mode<synchronous>, transform_indices = @transform_9, window_bounds = array<i64: 1, 32>}, {pipeline_mode = #tpu.pipeline_mode<synchronous>, transform_indices = @transform_10, window_bounds = array<i64: 16, 32>}]} {
    %c0_i32 = arith.constant 0 : i32
    %0 = arith.cmpi eq, %arg0, %c0_i32 : i32
    %1 = arith.extui %0 : i1 to i32
    %c0_i32_0 = arith.constant 0 : i32
    %2 = arith.cmpi ne, %1, %c0_i32_0 : i32
    scf.if %2 {
      %cst_10 = arith.constant 0.000000e+00 : f32
      %13 = vector.broadcast %cst_10 : f32 to vector<16x32xf32>
      %c0_11 = arith.constant 0 : index
      %c0_12 = arith.constant 0 : index
      %14 = vector.load %arg12[%c0_11, %c0_12] : memref<16x32xf32, #tpu.memory_space<vmem>>, vector<16x32xf32>
      tpu.vector_store %arg12[%c0_11, %c0_12], %13 {strides = array<i32>} : memref<16x32xf32, #tpu.memory_space<vmem>>, vector<16x32xf32>,
    } else {
    }
    %c0 = arith.constant 0 : index
    %c0_1 = arith.constant 0 : index
    %3 = vector.load %arg12[%c0, %c0_1] : memref<16x32xf32, #tpu.memory_space<vmem>>, vector<16x32xf32>
    %c0_2 = arith.constant 0 : index
    %c0_3 = arith.constant 0 : index
    %4 = vector.load %arg1[%c0_2, %c0_3] : memref<16x64xbf16, #tpu.memory_space<vmem>>, vector<16x64xbf16>
    %5 = arith.extf %4 : vector<16x64xbf16> to vector<16x64xf32>
    %c0_4 = arith.constant 0 : index
    %c0_5 = arith.constant 0 : index
    %6 = vector.load %arg2[%c0_4, %c0_5] : memref<64x32xf32, #tpu.memory_space<vmem>>, vector<64x32xf32>
    %cst = arith.constant dense<0.000000e+00> : vector<16x32xf32>
    %7 = tpu.matmul %5, %6, %cst {dimension_numbers = #tpu.dot_dimension_numbers<[1], [0], [0], [1], [0, 0, 1, 1], [], []>} : vector<16x64xf32>, vector<64x32xf32>, vector<16x32xf32> -> vector<16x32xf32>
    %8 = arith.addf %3, %7 : vector<16x32xf32>
    %c0_6 = arith.constant 0 : index
    %c0_7 = arith.constant 0 : index
    %9 = vector.load %arg12[%c0_6, %c0_7] : memref<16x32xf32, #tpu.memory_space<vmem>>, vector<16x32xf32>
    tpu.vector_store %arg12[%c0_6, %c0_7], %8 {strides = array<i32>} : memref<16x32xf32, #tpu.memory_space<vmem>>, vector<16x32xf32>,
    %c0_i32_8 = arith.constant 0 : i32
    %10 = arith.cmpi eq, %arg0, %c0_i32_8 : i32
    %11 = arith.extui %10 : i1 to i32
    %c0_i32_9 = arith.constant 0 : i32
    %12 = arith.cmpi ne, %11, %c0_i32_9 : i32
    scf.if %12 {
      %c0_10 = arith.constant 0 : index
      %c0_11 = arith.constant 0 : index
      %13 = vector.load %arg12[%c0_10, %c0_11] : memref<16x32xf32, #tpu.memory_space<vmem>>, vector<16x32xf32>
      %c0_12 = arith.constant 0 : index
      %c0_13 = arith.constant 0 : index
      %14 = vector.load %arg3[%c0_12, %c0_13] : memref<16x1xf32, #tpu.memory_space<vmem>>, vector<16x1xf32>
      %15 = vector.broadcast %14 : vector<16x1xf32> to vector<16x32xf32>
      %16 = arith.mulf %13, %15 : vector<16x32xf32>
      %c0_14 = arith.constant 0 : index
      %c0_15 = arith.constant 0 : index
      %17 = vector.load %arg5[%c0_14, %c0_15] : memref<32x32xf32, #tpu.memory_space<vmem>>, vector<32x32xf32>
      %cst_16 = arith.constant dense<0.000000e+00> : vector<16x32xf32>
      %18 = tpu.matmul %16, %17, %cst_16 {dimension_numbers = #tpu.dot_dimension_numbers<[1], [0], [0], [1], [0, 0, 1, 1], [], []>} : vector<16x32xf32>, vector<32x32xf32>, vector<16x32xf32> -> vector<16x32xf32>
      %c0_17 = arith.constant 0 : index
      %c0_18 = arith.constant 0 : index
      %19 = vector.load %arg6[%c0_17, %c0_18] : memref<1x32xf32, #tpu.memory_space<vmem>>, vector<1x32xf32>
      %20 = vector.broadcast %19 : vector<1x32xf32> to vector<16x32xf32>
      %21 = arith.addf %18, %20 : vector<16x32xf32>
      %cst_19 = arith.constant dense<0.000000e+00> : vector<32xf32>
      %22 = vector.multi_reduction <add>, %21, %cst_19 [0] : vector<16x32xf32> to vector<32xf32>
      %23 = vector.shape_cast %22 : vector<32xf32> to vector<1x32xf32>
      %cst_20 = arith.constant 1.600000e+01 : f32
      %24 = vector.broadcast %cst_20 : f32 to vector<1x32xf32>
      %25 = arith.divf %23, %24 : vector<1x32xf32>
      %26 = vector.broadcast %25 : vector<1x32xf32> to vector<16x32xf32>
      %27 = arith.subf %21, %26 : vector<16x32xf32>
      %28 = arith.mulf %27, %27 : vector<16x32xf32>
      %cst_21 = arith.constant dense<0.000000e+00> : vector<32xf32>
      %29 = vector.multi_reduction <add>, %28, %cst_21 [0] : vector<16x32xf32> to vector<32xf32>
      %30 = vector.shape_cast %29 : vector<32xf32> to vector<1x32xf32>
      %cst_22 = arith.constant 1.600000e+01 : f32
      %31 = vector.broadcast %cst_22 : f32 to vector<1x32xf32>
      %32 = arith.divf %30, %31 : vector<1x32xf32>
      %cst_23 = arith.constant 9.99999974E-6 : f32
      %33 = vector.broadcast %cst_23 : f32 to vector<1x32xf32>
      %34 = arith.addf %32, %33 : vector<1x32xf32>
      %35 = math.rsqrt %34 : vector<1x32xf32>
      %36 = vector.broadcast %35 : vector<1x32xf32> to vector<16x32xf32>
      %37 = arith.mulf %27, %36 : vector<16x32xf32>
      %c0_24 = arith.constant 0 : index
      %c0_25 = arith.constant 0 : index
      %38 = vector.load %arg7[%c0_24, %c0_25] : memref<1x32xf32, #tpu.memory_space<vmem>>, vector<1x32xf32>
      %39 = vector.broadcast %38 : vector<1x32xf32> to vector<16x32xf32>
      %40 = arith.mulf %37, %39 : vector<16x32xf32>
      %c0_26 = arith.constant 0 : index
      %c0_27 = arith.constant 0 : index
      %41 = vector.load %arg8[%c0_26, %c0_27] : memref<1x32xf32, #tpu.memory_space<vmem>>, vector<1x32xf32>
      %42 = vector.broadcast %41 : vector<1x32xf32> to vector<16x32xf32>
      %43 = arith.addf %40, %42 : vector<16x32xf32>
      %cst_28 = arith.constant 0.000000e+00 : f32
      %44 = vector.broadcast %cst_28 : f32 to vector<16x32xf32>
      %45 = arith.maximumf %43, %44 : vector<16x32xf32>
      %c0_29 = arith.constant 0 : index
      %c0_30 = arith.constant 0 : index
      %46 = vector.load %arg4[%c0_29, %c0_30] : memref<16x32xf32, #tpu.memory_space<vmem>>, vector<16x32xf32>
      %c0_31 = arith.constant 0 : index
      %c0_32 = arith.constant 0 : index
      %47 = vector.load %arg9[%c0_31, %c0_32] : memref<32x32xf32, #tpu.memory_space<vmem>>, vector<32x32xf32>
      %cst_33 = arith.constant dense<0.000000e+00> : vector<16x32xf32>
      %48 = tpu.matmul %45, %47, %cst_33 {dimension_numbers = #tpu.dot_dimension_numbers<[1], [0], [0], [1], [0, 0, 1, 1], [], []>} : vector<16x32xf32>, vector<32x32xf32>, vector<16x32xf32> -> vector<16x32xf32>
      %49 = arith.addf %46, %48 : vector<16x32xf32>
      %c0_34 = arith.constant 0 : index
      %c0_35 = arith.constant 0 : index
      %50 = vector.load %arg10[%c0_34, %c0_35] : memref<1x32xf32, #tpu.memory_space<vmem>>, vector<1x32xf32>
      %51 = vector.broadcast %50 : vector<1x32xf32> to vector<16x32xf32>
      %52 = arith.addf %49, %51 : vector<16x32xf32>
      %c0_36 = arith.constant 0 : index
      %c0_37 = arith.constant 0 : index
      %53 = vector.load %arg11[%c0_36, %c0_37] : memref<16x32xf32, #tpu.memory_space<vmem>>, vector<16x32xf32>
      tpu.vector_store %arg11[%c0_36, %c0_37], %52 {strides = array<i32>} : memref<16x32xf32, #tpu.memory_space<vmem>>, vector<16x32xf32>,
    } else {
    }
    return
  }
  func.func @transform_0(%arg0: i32) -> (i32, i32) {
    %c0_i32 = arith.constant 0 : i32
    %c0_i32_0 = arith.constant 0 : i32
    return %c0_i32, %arg0 : i32, i32
  }
  func.func @transform_1(%arg0: i32) -> (i32, i32) {
    %c0_i32 = arith.constant 0 : i32
    %c0_i32_0 = arith.constant 0 : i32
    return %arg0, %c0_i32 : i32, i32
  }
  func.func @transform_2(%arg0: i32) -> (i32, i32) {
    %c0_i32 = arith.constant 0 : i32
    %c0_i32_0 = arith.constant 0 : i32
    %c0_i32_1 = arith.constant 0 : i32
    return %c0_i32, %c0_i32_0 : i32, i32
  }
  func.func @transform_3(%arg0: i32) -> (i32, i32) {
    %c0_i32 = arith.constant 0 : i32
    %c0_i32_0 = arith.constant 0 : i32
    %c0_i32_1 = arith.constant 0 : i32
    return %c0_i32, %c0_i32_0 : i32, i32
  }
  func.func @transform_4(%arg0: i32) -> (i32, i32) {
    %c0_i32 = arith.constant 0 : i32
    %c0_i32_0 = arith.constant 0 : i32
    %c0_i32_1 = arith.constant 0 : i32
    return %c0_i32, %c0_i32_0 : i32, i32
  }
  func.func @transform_5(%arg0: i32) -> (i32, i32) {
    %c0_i32 = arith.constant 0 : i32
    %c0_i32_0 = arith.constant 0 : i32
    %c0_i32_1 = arith.constant 0 : i32
    return %c0_i32, %c0_i32_0 : i32, i32
  }
  func.func @transform_6(%arg0: i32) -> (i32, i32) {
    %c0_i32 = arith.constant 0 : i32
    %c0_i32_0 = arith.constant 0 : i32
    %c0_i32_1 = arith.constant 0 : i32
    return %c0_i32, %c0_i32_0 : i32, i32
  }
  func.func @transform_7(%arg0: i32) -> (i32, i32) {
    %c0_i32 = arith.constant 0 : i32
    %c0_i32_0 = arith.constant 0 : i32
    %c0_i32_1 = arith.constant 0 : i32
    return %c0_i32, %c0_i32_0 : i32, i32
  }
  func.func @transform_8(%arg0: i32) -> (i32, i32) {
    %c0_i32 = arith.constant 0 : i32
    %c0_i32_0 = arith.constant 0 : i32
    %c0_i32_1 = arith.constant 0 : i32
    return %c0_i32, %c0_i32_0 : i32, i32
  }
  func.func @transform_9(%arg0: i32) -> (i32, i32) {
    %c0_i32 = arith.constant 0 : i32
    %c0_i32_0 = arith.constant 0 : i32
    %c0_i32_1 = arith.constant 0 : i32
    return %c0_i32, %c0_i32_0 : i32, i32
  }
  func.func @transform_10(%arg0: i32) -> (i32, i32) {
    %c0_i32 = arith.constant 0 : i32
    %c0_i32_0 = arith.constant 0 : i32
    %c0_i32_1 = arith.constant 0 : i32
    return %c0_i32, %c0_i32_0 : i32, i32
  }
}

module attributes {stable_mosaic.version = 11 : i64} {
  func.func @_agg_mlp_kernel(%arg0: i32, %arg1: memref<24x64xbf16, #tpu.memory_space<vmem>>, %arg2: memref<64x32xf32, #tpu.memory_space<vmem>>, %arg3: memref<24x1xf32, #tpu.memory_space<vmem>>, %arg4: memref<24x32xf32, #tpu.memory_space<vmem>>, %arg5: memref<32x32xf32, #tpu.memory_space<vmem>>, %arg6: memref<1x32xf32, #tpu.memory_space<vmem>>, %arg7: memref<1x32xf32, #tpu.memory_space<vmem>>, %arg8: memref<1x32xf32, #tpu.memory_space<vmem>>, %arg9: memref<32x32xf32, #tpu.memory_space<vmem>>, %arg10: memref<1x32xf32, #tpu.memory_space<vmem>>, %arg11: memref<24x32xf32, #tpu.memory_space<vmem>>, %arg12: memref<24x32xf32, #tpu.memory_space<vmem>>) attributes {dimension_semantics = [#tpu.dimension_semantics<arbitrary>], iteration_bounds = array<i64: 1>, scalar_prefetch = 0 : i64, scratch_operands = 1 : i64, tpu.core_type = #tpu.core_type<tc>, window_params = [{transform_indices = @transform_0, window_bounds = array<i64: 24, 64>}, {transform_indices = @transform_1, window_bounds = array<i64: 64, 32>}, {pipeline_mode = #tpu.pipeline_mode<synchronous>, transform_indices = @transform_2, window_bounds = array<i64: 24, 1>}, {pipeline_mode = #tpu.pipeline_mode<synchronous>, transform_indices = @transform_3, window_bounds = array<i64: 24, 32>}, {pipeline_mode = #tpu.pipeline_mode<synchronous>, transform_indices = @transform_4, window_bounds = array<i64: 32, 32>}, {pipeline_mode = #tpu.pipeline_mode<synchronous>, transform_indices = @transform_5, window_bounds = array<i64: 1, 32>}, {pipeline_mode = #tpu.pipeline_mode<synchronous>, transform_indices = @transform_6, window_bounds = array<i64: 1, 32>}, {pipeline_mode = #tpu.pipeline_mode<synchronous>, transform_indices = @transform_7, window_bounds = array<i64: 1, 32>}, {pipeline_mode = #tpu.pipeline_mode<synchronous>, transform_indices = @transform_8, window_bounds = array<i64: 32, 32>}, {pipeline_mode = #tpu.pipeline_mode<synchronous>, transform_indices = @transform_9, window_bounds = array<i64: 1, 32>}, {pipeline_mode = #tpu.pipeline_mode<synchronous>, transform_indices = @transform_10, window_bounds = array<i64: 24, 32>}]} {
    %c0_i32 = arith.constant 0 : i32
    %0 = arith.cmpi eq, %arg0, %c0_i32 : i32
    %1 = arith.extui %0 : i1 to i32
    %c0_i32_0 = arith.constant 0 : i32
    %2 = arith.cmpi ne, %1, %c0_i32_0 : i32
    scf.if %2 {
      %cst_10 = arith.constant 0.000000e+00 : f32
      %13 = vector.broadcast %cst_10 : f32 to vector<24x32xf32>
      %c0_11 = arith.constant 0 : index
      %c0_12 = arith.constant 0 : index
      %14 = vector.load %arg12[%c0_11, %c0_12] : memref<24x32xf32, #tpu.memory_space<vmem>>, vector<24x32xf32>
      tpu.vector_store %arg12[%c0_11, %c0_12], %13 {strides = array<i32>} : memref<24x32xf32, #tpu.memory_space<vmem>>, vector<24x32xf32>,
    } else {
    }
    %c0 = arith.constant 0 : index
    %c0_1 = arith.constant 0 : index
    %3 = vector.load %arg12[%c0, %c0_1] : memref<24x32xf32, #tpu.memory_space<vmem>>, vector<24x32xf32>
    %c0_2 = arith.constant 0 : index
    %c0_3 = arith.constant 0 : index
    %4 = vector.load %arg1[%c0_2, %c0_3] : memref<24x64xbf16, #tpu.memory_space<vmem>>, vector<24x64xbf16>
    %5 = arith.extf %4 : vector<24x64xbf16> to vector<24x64xf32>
    %c0_4 = arith.constant 0 : index
    %c0_5 = arith.constant 0 : index
    %6 = vector.load %arg2[%c0_4, %c0_5] : memref<64x32xf32, #tpu.memory_space<vmem>>, vector<64x32xf32>
    %cst = arith.constant dense<0.000000e+00> : vector<24x32xf32>
    %7 = tpu.matmul %5, %6, %cst {dimension_numbers = #tpu.dot_dimension_numbers<[1], [0], [0], [1], [0, 0, 1, 1], [], []>} : vector<24x64xf32>, vector<64x32xf32>, vector<24x32xf32> -> vector<24x32xf32>
    %8 = arith.addf %3, %7 : vector<24x32xf32>
    %c0_6 = arith.constant 0 : index
    %c0_7 = arith.constant 0 : index
    %9 = vector.load %arg12[%c0_6, %c0_7] : memref<24x32xf32, #tpu.memory_space<vmem>>, vector<24x32xf32>
    tpu.vector_store %arg12[%c0_6, %c0_7], %8 {strides = array<i32>} : memref<24x32xf32, #tpu.memory_space<vmem>>, vector<24x32xf32>,
    %c0_i32_8 = arith.constant 0 : i32
    %10 = arith.cmpi eq, %arg0, %c0_i32_8 : i32
    %11 = arith.extui %10 : i1 to i32
    %c0_i32_9 = arith.constant 0 : i32
    %12 = arith.cmpi ne, %11, %c0_i32_9 : i32
    scf.if %12 {
      %c0_10 = arith.constant 0 : index
      %c0_11 = arith.constant 0 : index
      %13 = vector.load %arg12[%c0_10, %c0_11] : memref<24x32xf32, #tpu.memory_space<vmem>>, vector<24x32xf32>
      %c0_12 = arith.constant 0 : index
      %c0_13 = arith.constant 0 : index
      %14 = vector.load %arg3[%c0_12, %c0_13] : memref<24x1xf32, #tpu.memory_space<vmem>>, vector<24x1xf32>
      %15 = vector.broadcast %14 : vector<24x1xf32> to vector<24x32xf32>
      %16 = arith.mulf %13, %15 : vector<24x32xf32>
      %c0_14 = arith.constant 0 : index
      %c0_15 = arith.constant 0 : index
      %17 = vector.load %arg5[%c0_14, %c0_15] : memref<32x32xf32, #tpu.memory_space<vmem>>, vector<32x32xf32>
      %cst_16 = arith.constant dense<0.000000e+00> : vector<24x32xf32>
      %18 = tpu.matmul %16, %17, %cst_16 {dimension_numbers = #tpu.dot_dimension_numbers<[1], [0], [0], [1], [0, 0, 1, 1], [], []>} : vector<24x32xf32>, vector<32x32xf32>, vector<24x32xf32> -> vector<24x32xf32>
      %c0_17 = arith.constant 0 : index
      %c0_18 = arith.constant 0 : index
      %19 = vector.load %arg6[%c0_17, %c0_18] : memref<1x32xf32, #tpu.memory_space<vmem>>, vector<1x32xf32>
      %20 = vector.broadcast %19 : vector<1x32xf32> to vector<24x32xf32>
      %21 = arith.addf %18, %20 : vector<24x32xf32>
      %cst_19 = arith.constant dense<0.000000e+00> : vector<32xf32>
      %22 = vector.multi_reduction <add>, %21, %cst_19 [0] : vector<24x32xf32> to vector<32xf32>
      %23 = vector.shape_cast %22 : vector<32xf32> to vector<1x32xf32>
      %cst_20 = arith.constant 2.400000e+01 : f32
      %24 = vector.broadcast %cst_20 : f32 to vector<1x32xf32>
      %25 = arith.divf %23, %24 : vector<1x32xf32>
      %26 = vector.broadcast %25 : vector<1x32xf32> to vector<24x32xf32>
      %27 = arith.subf %21, %26 : vector<24x32xf32>
      %28 = arith.mulf %27, %27 : vector<24x32xf32>
      %cst_21 = arith.constant dense<0.000000e+00> : vector<32xf32>
      %29 = vector.multi_reduction <add>, %28, %cst_21 [0] : vector<24x32xf32> to vector<32xf32>
      %30 = vector.shape_cast %29 : vector<32xf32> to vector<1x32xf32>
      %cst_22 = arith.constant 2.400000e+01 : f32
      %31 = vector.broadcast %cst_22 : f32 to vector<1x32xf32>
      %32 = arith.divf %30, %31 : vector<1x32xf32>
      %cst_23 = arith.constant 9.99999974E-6 : f32
      %33 = vector.broadcast %cst_23 : f32 to vector<1x32xf32>
      %34 = arith.addf %32, %33 : vector<1x32xf32>
      %35 = math.rsqrt %34 : vector<1x32xf32>
      %36 = vector.broadcast %35 : vector<1x32xf32> to vector<24x32xf32>
      %37 = arith.mulf %27, %36 : vector<24x32xf32>
      %c0_24 = arith.constant 0 : index
      %c0_25 = arith.constant 0 : index
      %38 = vector.load %arg7[%c0_24, %c0_25] : memref<1x32xf32, #tpu.memory_space<vmem>>, vector<1x32xf32>
      %39 = vector.broadcast %38 : vector<1x32xf32> to vector<24x32xf32>
      %40 = arith.mulf %37, %39 : vector<24x32xf32>
      %c0_26 = arith.constant 0 : index
      %c0_27 = arith.constant 0 : index
      %41 = vector.load %arg8[%c0_26, %c0_27] : memref<1x32xf32, #tpu.memory_space<vmem>>, vector<1x32xf32>
      %42 = vector.broadcast %41 : vector<1x32xf32> to vector<24x32xf32>
      %43 = arith.addf %40, %42 : vector<24x32xf32>
      %cst_28 = arith.constant 0.000000e+00 : f32
      %44 = vector.broadcast %cst_28 : f32 to vector<24x32xf32>
      %45 = arith.maximumf %43, %44 : vector<24x32xf32>
      %c0_29 = arith.constant 0 : index
      %c0_30 = arith.constant 0 : index
      %46 = vector.load %arg4[%c0_29, %c0_30] : memref<24x32xf32, #tpu.memory_space<vmem>>, vector<24x32xf32>
      %c0_31 = arith.constant 0 : index
      %c0_32 = arith.constant 0 : index
      %47 = vector.load %arg9[%c0_31, %c0_32] : memref<32x32xf32, #tpu.memory_space<vmem>>, vector<32x32xf32>
      %cst_33 = arith.constant dense<0.000000e+00> : vector<24x32xf32>
      %48 = tpu.matmul %45, %47, %cst_33 {dimension_numbers = #tpu.dot_dimension_numbers<[1], [0], [0], [1], [0, 0, 1, 1], [], []>} : vector<24x32xf32>, vector<32x32xf32>, vector<24x32xf32> -> vector<24x32xf32>
      %49 = arith.addf %46, %48 : vector<24x32xf32>
      %c0_34 = arith.constant 0 : index
      %c0_35 = arith.constant 0 : index
      %50 = vector.load %arg10[%c0_34, %c0_35] : memref<1x32xf32, #tpu.memory_space<vmem>>, vector<1x32xf32>
      %51 = vector.broadcast %50 : vector<1x32xf32> to vector<24x32xf32>
      %52 = arith.addf %49, %51 : vector<24x32xf32>
      %c0_36 = arith.constant 0 : index
      %c0_37 = arith.constant 0 : index
      %53 = vector.load %arg11[%c0_36, %c0_37] : memref<24x32xf32, #tpu.memory_space<vmem>>, vector<24x32xf32>
      tpu.vector_store %arg11[%c0_36, %c0_37], %52 {strides = array<i32>} : memref<24x32xf32, #tpu.memory_space<vmem>>, vector<24x32xf32>,
    } else {
    }
    return
  }
  func.func @transform_0(%arg0: i32) -> (i32, i32) {
    %c0_i32 = arith.constant 0 : i32
    %c0_i32_0 = arith.constant 0 : i32
    return %c0_i32, %arg0 : i32, i32
  }
  func.func @transform_1(%arg0: i32) -> (i32, i32) {
    %c0_i32 = arith.constant 0 : i32
    %c0_i32_0 = arith.constant 0 : i32
    return %arg0, %c0_i32 : i32, i32
  }
  func.func @transform_2(%arg0: i32) -> (i32, i32) {
    %c0_i32 = arith.constant 0 : i32
    %c0_i32_0 = arith.constant 0 : i32
    %c0_i32_1 = arith.constant 0 : i32
    return %c0_i32, %c0_i32_0 : i32, i32
  }
  func.func @transform_3(%arg0: i32) -> (i32, i32) {
    %c0_i32 = arith.constant 0 : i32
    %c0_i32_0 = arith.constant 0 : i32
    %c0_i32_1 = arith.constant 0 : i32
    return %c0_i32, %c0_i32_0 : i32, i32
  }
  func.func @transform_4(%arg0: i32) -> (i32, i32) {
    %c0_i32 = arith.constant 0 : i32
    %c0_i32_0 = arith.constant 0 : i32
    %c0_i32_1 = arith.constant 0 : i32
    return %c0_i32, %c0_i32_0 : i32, i32
  }
  func.func @transform_5(%arg0: i32) -> (i32, i32) {
    %c0_i32 = arith.constant 0 : i32
    %c0_i32_0 = arith.constant 0 : i32
    %c0_i32_1 = arith.constant 0 : i32
    return %c0_i32, %c0_i32_0 : i32, i32
  }
  func.func @transform_6(%arg0: i32) -> (i32, i32) {
    %c0_i32 = arith.constant 0 : i32
    %c0_i32_0 = arith.constant 0 : i32
    %c0_i32_1 = arith.constant 0 : i32
    return %c0_i32, %c0_i32_0 : i32, i32
  }
  func.func @transform_7(%arg0: i32) -> (i32, i32) {
    %c0_i32 = arith.constant 0 : i32
    %c0_i32_0 = arith.constant 0 : i32
    %c0_i32_1 = arith.constant 0 : i32
    return %c0_i32, %c0_i32_0 : i32, i32
  }
  func.func @transform_8(%arg0: i32) -> (i32, i32) {
    %c0_i32 = arith.constant 0 : i32
    %c0_i32_0 = arith.constant 0 : i32
    %c0_i32_1 = arith.constant 0 : i32
    return %c0_i32, %c0_i32_0 : i32, i32
  }
  func.func @transform_9(%arg0: i32) -> (i32, i32) {
    %c0_i32 = arith.constant 0 : i32
    %c0_i32_0 = arith.constant 0 : i32
    %c0_i32_1 = arith.constant 0 : i32
    return %c0_i32, %c0_i32_0 : i32, i32
  }
  func.func @transform_10(%arg0: i32) -> (i32, i32) {
    %c0_i32 = arith.constant 0 : i32
    %c0_i32_0 = arith.constant 0 : i32
    %c0_i32_1 = arith.constant 0 : i32
    return %c0_i32, %c0_i32_0 : i32, i32
  }
}

</mosaic_0001>

<bundles_post_ra>
// kernel: eq.24
= control target key start
LH: loop header
LB: loop body
LE: loop exit
PB: predicated region body
PF: predicated region fallthrough
CT: control target
= control target key end

     0   :  { %s133_s10 = smov 60   ;;  %s134_s11 = smov 52   ;;  %vm3_vm0 = vcmask 31744   ;;  %vm9_vm1 = vcmask 523744   ;;  %vm15_vm2 = vcmask 490944   ;;  %vm21_vm3 = vcmask 458144   ;;  %s209_s0 = inlined_call_operand.vmem [shape: s32[2,8,4], index: 0, kind: input, shape index: {}]   ;;  %s210_s1 = inlined_call_operand.vmem [shape: s32[64], index: 1, kind: output, shape index: {}]  }
   0x1   :  { %v103_v0 = vld [vmem:[%s209_s0 + $0xf] sm:$0x1]   ;;  %v105_v1 = vld [vmem:[%s209_s0 + $0xd] sm:$0x1]   ;;  %v104_v2 = vld [vmem:[%s209_s0 + $0xe] sm:$0x1]  }
   0x2   :  { %7 = vrot.lane.b32.xlu0 %v103_v0, %s133_s10  ;;  %19 = vrot.lane.b32.xlu1 %v105_v1, %s134_s11  ;;  %v106_v3 = vld [vmem:[%s209_s0 + $0xc] sm:$0x1]   ;;  %s135_s16 = smov 56   ;;  %s136_s17 = smov 48   ;;  %v107_v4 = vld [vmem:[%s209_s0 + $0xb] sm:$0x1]  }
   0x3   :  { %v108_v5 = vld [vmem:[%s209_s0 + $0xa] sm:$0x1]   ;;  %v2_v6 = vld [vmem:[%s209_s0] sm:$0x1]   ;;  %s137_s24 = smov 44   ;;  %s138_s25 = smov 40  }
   0x4   :  { %4 = vst.msk [vmem:[#allocation0] sm:$0x1] %vm3_vm0, %v2_v6   ;;  %v109_v7 = vld [vmem:[%s209_s0 + $0x9] sm:$0x1]   ;;  %v110_v8 = vld [vmem:[%s209_s0 + $0x8] sm:$0x1]  }
   0x5   :  { %s139_s30 = smov 36   ;;  %s140_s2 = smov 32   ;;  %v111_v9 = vld [vmem:[%s209_s0 + $0x7] sm:$0x1]   ;;  %v112_v10 = vld [vmem:[%s209_s0 + $0x6] sm:$0x1]  }
   0x6   :  { %13 = vrot.lane.b32.xlu0 %v104_v2, %s135_s16  ;;  %25 = vrot.lane.b32.xlu1 %v106_v3, %s136_s17  ;;  %s141_s7 = smov 28   ;;  %s142_s8 = smov 24   ;;  %v113_v11 = vld [vmem:[%s209_s0 + $0x5] sm:$0x1]   ;;  %v114_v12 = vld [vmem:[%s209_s0 + $0x4] sm:$0x1]  }
   0x7   :  { %s143_s13 = smov 20   ;;  %s144_s14 = smov 16   ;;  %v115_v13 = vld [vmem:[%s209_s0 + $0x3] sm:$0x1]   ;;  %v116_v14 = vld [vmem:[%s209_s0 + $0x2] sm:$0x1]  }
   0x8   :  { %s145_s19 = smov 12   ;;  %s146_s20 = smov 8   ;;  %v117_v15 = vld [vmem:[%s209_s0 + $0x1] sm:$0x1]   ;;  %vm27_vm4 = vcmask 425344   ;;  %vm33_vm5 = vcmask 392544  }
   0x9   :  { %s147_s0 = smov 4   ;;  %vm39_vm6 = vcmask 359744   ;;  %vm45_vm7 = vcmask 326944   ;;  %vm51_vm8 = vcmask 294144   ;;  %vm57_vm9 = vcmask 261344  }
   0xa   :  { %31 = vrot.lane.b32.xlu0 %v107_v4, %s137_s24  ;;  %37 = vrot.lane.b32.xlu1 %v108_v5, %s138_s25  ;;  %vm63_vm10 = vcmask 228544   ;;  %vm69_vm11 = vcmask 195744   ;;  %vm75_vm12 = vcmask 162944   ;;  %vm81_vm13 = vcmask 130144  }
   0xb   :  { %vm87_vm14 = vcmask 97344   ;;  %vm93_vm15 = vcmask 64544  }
   0xe   :  { %43 = vrot.lane.b32.xlu0 %v109_v7, %s139_s30  ;;  %49 = vrot.lane.b32.xlu1 %v110_v8, %s140_s2 }
  0x12   :  { %55 = vrot.lane.b32.xlu0 %v111_v9, %s141_s7  ;;  %61 = vrot.lane.b32.xlu1 %v112_v10, %s142_s8 }
  0x16   :  { %67 = vrot.lane.b32.xlu0 %v113_v11, %s143_s13  ;;  %73 = vrot.lane.b32.xlu1 %v114_v12, %s144_s14 }
  0x1a   :  { %79 = vrot.lane.b32.xlu0 %v115_v13, %s145_s19  ;;  %85 = vrot.lane.b32.xlu1 %v116_v14, %s146_s20 }
  0x1e   :  { %91 = vrot.lane.b32.xlu0 %v117_v15, %s147_s0 }
  0x74   :  { %v8_v16 = vpop.permute.xlu0 %7   ;;  %v20_v17 = vpop.permute.xlu1 %19  }
  0x75   :  { %10 = vst.msk [vmem:[#allocation0] sm:$0x1] %vm9_vm1, %v8_v16  }
  0x78   :  { %v14_v18 = vpop.permute.xlu0 %13   ;;  %v26_v19 = vpop.permute.xlu1 %25  }
  0x79   :  { %16 = vst.msk [vmem:[#allocation0] sm:$0x1] %vm15_vm2, %v14_v18  }
  0x7a   :  { %22 = vst.msk [vmem:[#allocation0] sm:$0x1] %vm21_vm3, %v20_v17  }
  0x7b   :  { %28 = vst.msk [vmem:[#allocation0] sm:$0x1] %vm27_vm4, %v26_v19  }
  0x7c   :  { %v32_v20 = vpop.permute.xlu0 %31   ;;  %v38_v21 = vpop.permute.xlu1 %37  }
  0x7d   :  { %34 = vst.msk [vmem:[#allocation0] sm:$0x1] %vm33_vm5, %v32_v20  }
  0x7e   :  { %40 = vst.msk [vmem:[#allocation0] sm:$0x1] %vm39_vm6, %v38_v21  }
  0x80   :  { %v44_v22 = vpop.permute.xlu0 %43   ;;  %v50_v23 = vpop.permute.xlu1 %49  }
  0x81   :  { %46 = vst.msk [vmem:[#allocation0] sm:$0x1] %vm45_vm7, %v44_v22  }
  0x82   :  { %52 = vst.msk [vmem:[#allocation0] sm:$0x1] %vm51_vm8, %v50_v23  }
  0x84   :  { %v56_v24 = vpop.permute.xlu0 %55   ;;  %v62_v25 = vpop.permute.xlu1 %61  }
  0x85   :  { %58 = vst.msk [vmem:[#allocation0] sm:$0x1] %vm57_vm9, %v56_v24  }
  0x86   :  { %64 = vst.msk [vmem:[#allocation0] sm:$0x1] %vm63_vm10, %v62_v25  }
  0x88   :  { %v68_v26 = vpop.permute.xlu0 %67   ;;  %v74_v27 = vpop.permute.xlu1 %73  }
  0x89   :  { %70 = vst.msk [vmem:[#allocation0] sm:$0x1] %vm69_vm11, %v68_v26  }
  0x8a   :  { %76 = vst.msk [vmem:[#allocation0] sm:$0x1] %vm75_vm12, %v74_v27  }
  0x8c   :  { %v80_v28 = vpop.permute.xlu0 %79   ;;  %v86_v29 = vpop.permute.xlu1 %85  }
  0x8d   :  { %82 = vst.msk [vmem:[#allocation0] sm:$0x1] %vm81_vm13, %v80_v28  }
  0x8e   :  { %88 = vst.msk [vmem:[#allocation0] sm:$0x1] %vm87_vm14, %v86_v29  }
  0x90   :  { %v92_v30 = vpop.permute.xlu0 %91  }
  0x91   :  { %94 = vst.msk [vmem:[#allocation0] sm:$0x1] %vm93_vm15, %v92_v30  }
  0x98   :  { %v99_v31 = vld [vmem:[#allocation0] sm:$0x1] }
  0x99   :  { %102 = vst [vmem:[%s210_s1] sm:$0x1] %v99_v31 }

// kernel: tile.57
= control target key start
LH: loop header
LB: loop body
LE: loop exit
PB: predicated region body
PF: predicated region fallthrough
CT: control target
= control target key end

     0   :  { %vm48_vm0 = vcmask 1047556   ;;  %vm50_vm1 = vcmask 261120   ;;  %s131_s24 = smov 96   ;;  %s132_s29 = smov 32   ;;  %vm65_vm2 = vcmask 1048320   ;;  %vm82_vm3 = vcmask 785920   ;;  %s200_s0 = inlined_call_operand.vmem [shape: f32[9,4,32], index: 0, kind: input, shape index: {}]   ;;  %s201_s1 = inlined_call_operand.vmem [shape: f32[9,128], index: 1, kind: output, shape index: {}]  }
   0x1   :  { %v115_v0 = vld [vmem:[%s200_s0 + $0x20] sm:$0xf]  ;;  %v116_v1 = vld [vmem:[%s200_s0 + $0x1c] sm:$0xf]  ;;  %v117_v2 = vld [vmem:[%s200_s0 + $0x18] sm:$0xf] }
   0x2   :  { %9 = vst [vmem:[#allocation0 + $0x40] sm:$0xf] %v115_v0  ;;  %14 = vst [vmem:[#allocation0 + $0x38] sm:$0xf] %v116_v1  ;;  %v118_v3 = vld [vmem:[%s200_s0 + $0x14] sm:$0xf] }
   0x3   :  { %v119_v4 = vld [vmem:[%s200_s0 + $0x10] sm:$0xf]  ;;  %19 = vst [vmem:[#allocation0 + $0x30] sm:$0xf] %v117_v2  ;;  %24 = vst [vmem:[#allocation0 + $0x28] sm:$0xf] %v118_v3 }
   0x4   :  { %29 = vst [vmem:[#allocation0 + $0x20] sm:$0xf] %v119_v4  ;;  %v120_v5 = vld [vmem:[%s200_s0 + $0xc] sm:$0xf]  ;;  %v121_v6 = vld [vmem:[%s200_s0 + $0x8] sm:$0xf] }
   0x5   :  { %v122_v7 = vld [vmem:[%s200_s0 + $0x4] sm:$0xf]  ;;  %34 = vst [vmem:[#allocation0 + $0x18] sm:$0xf] %v120_v5  ;;  %39 = vst [vmem:[#allocation0 + $0x10] sm:$0xf] %v121_v6 }
   0x6   :  { %43 = vst [vmem:[#allocation0 + $0x8] sm:$0xf] %v122_v7  ;;  %v44_v8 = vld [vmem:[%s200_s0] sm:$0xf]  ;;  %s130_s0 = smov 64   ;;  %vm99_vm4 = vcmask 523520  }
   0x7   :  { %45 = vst [vmem:[#allocation0] sm:$0xf] %v44_v8 }
   0x9   :  { %v85_v9 = vld [vmem:[#allocation0 + $0x42] sm:$0x1]   ;;  %v68_v10 = vld [vmem:[#allocation0 + $0x43] sm:$0x1]   ;;  %v53_v14 = vld [vmem:[#allocation0 + $0x40] sm:$0x1]  }
   0xa   :  { %86 = vrot.lane.b32.xlu1 %v85_v9, %s130_s0  ;;  %69 = vrot.lane.b32.xlu0 %v68_v10, %s131_s24  ;;  %123 = vst.msk [vmem:[%s201_s1 + $0x8] sm:$0x1] %vm50_vm1, %v53_v14   ;;  %v102_v22 = vld [vmem:[#allocation0 + $0x41] sm:$0x1]  }
   0xb   :  { %v77_v11 = vld [vmem:[#allocation0 + $0x2] ss:$8 sm:$0xf0]   ;;  %v60_v12 = vld [vmem:[#allocation0 + $0x3] ss:$8 sm:$0xf0]  }
   0xc   :  { %v94_v13 = vld [vmem:[#allocation0 + $0x1] ss:$8 sm:$0xf0]   ;;  %v47_v21 = vld [vmem:[#allocation0] ss:$8 sm:$0xf0]  }
   0xe   :  { %v75_v15 = vld [vmem:[#allocation0 + $0x2] ss:$8 sm:$0xf]   ;;  %v58_v16 = vld [vmem:[#allocation0 + $0x3] ss:$8 sm:$0xf]  }
   0xf   :  { %v79_v17 = vsel %vm48_vm0, %v77_v11, %v75_v15  ;;  %v62_v18 = vsel %vm48_vm0, %v60_v12, %v58_v16  ;;  %v92_v19 = vld [vmem:[#allocation0 + $0x1] ss:$8 sm:$0xf]   ;;  %v46_v20 = vld [vmem:[#allocation0] ss:$8 sm:$0xf]  }
  0x10   :  { %80 = vrot.lane.b32.xlu1 %v79_v17, %s130_s0  ;;  %63 = vrot.lane.b32.xlu0 %v62_v18, %s131_s24  ;;  %v96_v23 = vsel %vm48_vm0, %v94_v13, %v92_v19  ;;  %v49_v24 = vsel %vm48_vm0, %v47_v21, %v46_v20 }
  0x11   :  { %51 = vst.msk [vmem:[%s201_s1] sm:$0xff] %vm50_vm1, %v49_v24  }
  0x14   :  { %103 = vrot.lane.b32.xlu1 %v102_v22, %s132_s29  ;;  %97 = vrot.lane.b32.xlu0 %v96_v23, %s132_s29 }
  0x7c   :  { %v87_v25 = vpop.permute.xlu1 %86   ;;  %v70_v26 = vpop.permute.xlu0 %69  }
  0x7d   :  { %124 = vst.msk [vmem:[%s201_s1 + $0x8] sm:$0x1] %vm65_vm2, %v70_v26  }
  0x7e   :  { %125 = vst.msk [vmem:[%s201_s1 + $0x8] sm:$0x1] %vm82_vm3, %v87_v25  }
  0x82   :  { %v81_v27 = vpop.permute.xlu1 %80   ;;  %v64_v28 = vpop.permute.xlu0 %63  }
  0x83   :  { %66 = vst.msk [vmem:[%s201_s1] sm:$0xff] %vm65_vm2, %v64_v28  }
  0x84   :  { %83 = vst.msk [vmem:[%s201_s1] sm:$0xff] %vm82_vm3, %v81_v27  }
  0x86   :  { %v104_v29 = vpop.permute.xlu1 %103   ;;  %v98_v30 = vpop.permute.xlu0 %97  }
  0x87   :  { %126 = vst.msk [vmem:[%s201_s1 + $0x8] sm:$0x1] %vm99_vm4, %v104_v29   ;;  %100 = vst.msk [vmem:[%s201_s1] sm:$0xff] %vm99_vm4, %v98_v30  }

// kernel: squeeze.4
= control target key start
LH: loop header
LB: loop body
LE: loop exit
PB: predicated region body
PF: predicated region fallthrough
CT: control target
= control target key end

     0   :  { %s40_s8 = smov 32   ;;  %vm8_vm0 = vcmask 261120   ;;  %s41_s9 = smov 64   ;;  %s58_s0 = inlined_call_operand.vmem [shape: f32[128], index: 0, kind: input, shape index: {}]   ;;  %s59_s1 = inlined_call_operand.vmem [shape: f32[4,32], index: 1, kind: output, shape index: {}]  }
   0x1   :  { %v5_v0 = vld [vmem:[%s58_s0] sm:$0x1]  ;;  %s39_s0 = smov 96  }
   0x2   :  { %6 = vst [vmem:[#allocation1] sm:$0x1] %v5_v0 }
   0x9   :  { %v10_v1 = vld [vmem:[#allocation1] sm:$0x1]  }
   0xa   :  { %v22_v2 = vld [vmem:[#allocation1] sm:$0x1]   ;;  %11 = vrot.lane.b32.xlu0 %v10_v1, %s39_s0 }
   0xb   :  { %23 = vrot.lane.b32.xlu1 %v22_v2, %s40_s8  ;;  %v7_v3 = vld [vmem:[#allocation1] sm:$0x1]  }
   0xc   :  { %v16_v4 = vld [vmem:[#allocation1] sm:$0x1]   ;;  %9 = vst.msk [vmem:[#allocation0] sm:$0x1] %vm8_vm0, %v7_v3  }
   0xe   :  { %17 = vrot.lane.b32.xlu0 %v16_v4, %s41_s9 }
  0x7c   :  { %v12_v5 = vpop.permute.xlu0 %11  }
  0x7d   :  { %v24_v6 = vpop.permute.xlu1 %23   ;;  %15 = vst.msk [vmem:[#allocation0 + $0x1] sm:$0x1] %vm8_vm0, %v12_v5  }
  0x7e   :  { %27 = vst.msk [vmem:[#allocation0 + $0x3] sm:$0x1] %vm8_vm0, %v24_v6  }
  0x80   :  { %v18_v7 = vpop.permute.xlu0 %17  }
  0x81   :  { %21 = vst.msk [vmem:[#allocation0 + $0x2] sm:$0x1] %vm8_vm0, %v18_v7  }
  0x88   :  { %v32_v8 = vld [vmem:[#allocation0] sm:$0xf] }
  0x89   :  { %35 = vst [vmem:[%s59_s1] sm:$0xf] %v32_v8 }

// kernel: walk_encoder_forward.5
= control target key start
LH: loop header
LB: loop body
LE: loop exit
PB: predicated region body
PF: predicated region fallthrough
CT: control target
= control target key end

     0   :  { %s303_s3 = inlined_call_operand.vmem [shape: f32[128,128], index: 3, kind: input, shape index: {}]   ;;  %s304_s0 = inlined_call_operand.vmem [shape: f32[16,128], index: 0, kind: input, shape index: {}]   ;;  %s305_s1 = inlined_call_operand.vmem [shape: f32[1,128], index: 1, kind: input, shape index: {}]   ;;  %s306_s2 = inlined_call_operand.vmem [shape: f32[1,128], index: 2, kind: input, shape index: {}]   ;;  %s307_s4 = inlined_call_operand.vmem [shape: f32[1,128], index: 4, kind: input, shape index: {}]   ;;  %s308_s5 = inlined_call_operand.vmem [shape: f32[16,128], index: 5, kind: output, shape index: {}]  }
   0x1   :  { %v57_v0 = vld [vmem:[%s303_s3 + $0x78] sm:$0xff]  ;;  %v56_v1 = vld [vmem:[%s303_s3 + $0x70] sm:$0xff]  ;;  %v55_v2 = vld [vmem:[%s303_s3 + $0x68] sm:$0xff] }
   0x2   :  { %169 = vmatprep.subr.mxu0 %v57_v0  ;;  %v54_v3 = vld [vmem:[%s303_s3 + $0x60] sm:$0xff]  ;;  %v53_v5 = vld [vmem:[%s303_s3 + $0x58] sm:$0xff]  ;;  %v52_v9 = vld [vmem:[%s303_s3 + $0x50] sm:$0xff] }
   0x3   :  { %170 = vmatpush3.msra.mxu0 %v57_v0  ;;  %v20_v4 = vld [vmem:[%s304_s0] sm:$0xff]  ;;  %v51_v11 = vld [vmem:[%s303_s3 + $0x48] sm:$0xff]  ;;  %v49_v14 = vld [vmem:[%s303_s3 + $0x38] sm:$0xff] }
   0x4   :  { %171 = vmatprep.subr.mxu0 %v56_v1  ;;  %v148_v6 = vld [vmem:[%s305_s1] ss:$0 sm:$0xff]  ;;  %v48_v15 = vld [vmem:[%s303_s3 + $0x30] sm:$0xff]  ;;  %v47_v16 = vld [vmem:[%s303_s3 + $0x28] sm:$0xff] }
   0x5   :  { %172 = vmatpush3.msra.mxu0 %v56_v1  ;;  %v149_v7 = vld [vmem:[%s306_s2] ss:$0 sm:$0xff]  ;;  %v29_v8 = vmul.f32 %v148_v6, %v20_v4  ;;  %v21_v17 = vld [vmem:[%s304_s0 + $0x8] sm:$0xff]  ;;  %v45_v20 = vld [vmem:[%s303_s3 + $0x18] sm:$0xff] }
   0x6   :  { %173 = vmatprep.subr.mxu0 %v55_v2  ;;  %v50_v13 = vld [vmem:[%s303_s3 + $0x40] sm:$0xff]  ;;  %v30_v19 = vmul.f32 %v148_v6, %v21_v17  ;;  %v44_v21 = vld [vmem:[%s303_s3 + $0x10] sm:$0xff]  ;;  %v43_v23 = vld [vmem:[%s303_s3 + $0x8] sm:$0xff] }
   0x7   :  { %174 = vmatpush3.msra.mxu0 %v55_v2  ;;  %v38_v10 = vadd.f32 %v149_v7, %v29_v8  ;;  %v46_v18 = vld [vmem:[%s303_s3 + $0x20] sm:$0xff] }
   0x8   :  { %175 = vmatprep.subr.mxu0 %v54_v3  ;;  %v39_v22 = vadd.f32 %v149_v7, %v30_v19  ;;  %v42_v24 = vld [vmem:[%s303_s3] sm:$0xff] }
   0x9   :  { %176 = vmatpush3.msra.mxu0 %v54_v3  ;;  %v40_v12 = vmax.f32 %v38_v10, 0.0  ;;  %v150_v26 = vld [vmem:[%s307_s4] ss:$0 sm:$0xff] }
   0xa   :  { %177 = vmatprep.subr.mxu0 %v53_v5  ;;  %v41_v25 = vmax.f32 %v39_v22, 0.0 }
   0xb   :  { %178 = vmatpush3.msra.mxu0 %v53_v5  ;;  %201 = vmatprep.mubr.f32.mxu0 %v40_v12 }
   0xc   :  { %179 = vmatprep.subr.mxu0 %v52_v9 }
   0xd   :  { %180 = vmatpush3.msra.mxu0 %v52_v9 }
   0xe   :  { %181 = vmatprep.subr.mxu0 %v51_v11 }
   0xf   :  { %182 = vmatpush3.msra.mxu0 %v51_v11 }
  0x10   :  { %183 = vmatprep.subr.mxu0 %v50_v13 }
  0x11   :  { %184 = vmatpush3.msra.mxu0 %v50_v13 }
  0x12   :  { %185 = vmatprep.subr.mxu0 %v49_v14 }
  0x13   :  { %186 = vmatpush3.msra.mxu0 %v49_v14 }
  0x14   :  { %187 = vmatprep.subr.mxu0 %v48_v15 }
  0x15   :  { %188 = vmatpush3.msra.mxu0 %v48_v15 }
  0x16   :  { %189 = vmatprep.subr.mxu0 %v47_v16 }
  0x17   :  { %190 = vmatpush3.msra.mxu0 %v47_v16 }
  0x18   :  { %191 = vmatprep.subr.mxu0 %v46_v18 }
  0x19   :  { %192 = vmatpush3.msra.mxu0 %v46_v18 }
  0x1a   :  { %193 = vmatprep.subr.mxu0 %v45_v20 }
  0x1b   :  { %194 = vmatpush3.msra.mxu0 %v45_v20 }
  0x1c   :  { %195 = vmatprep.subr.mxu0 %v44_v21 }
  0x1d   :  { %196 = vmatpush3.msra.mxu0 %v44_v21 }
  0x1e   :  { %197 = vmatprep.subr.mxu0 %v43_v23 }
  0x1f   :  { %198 = vmatpush3.msra.mxu0 %v43_v23 }
  0x20   :  { %199 = vmatprep.subr.mxu0 %v42_v24 }
  0x21   :  { %200 = vmatpush3.msra.mxu0 %v42_v24 }
  0x22   :  { %202 = vmatmul.mubr.f32.vlgmr.msra.gmra.mxu0 %v41_v25 }
  0xe2   :  { %v203_v27 = vpop.f32.mrf.mxu0 }
  0xe3   :  { %v137_v28 = vadd.f32 %v203_v27, %v150_v26 }
  0xe4   :  { %v131_v29 = vpop.f32.mrf.mxu0 }
  0xe5   :  { %v141_v30 = vmax.f32 %v137_v28, 0.0  ;;  %v132_v31 = vadd.f32 %v150_v26, %v131_v29 }
  0xe7   :  { %143 = vst [vmem:[%s308_s5 + $0x8] sm:$0xff] %v141_v30  ;;  %v140_v32 = vmax.f32 %v132_v31, 0.0 }
  0xe9   :  { %142 = vst [vmem:[%s308_s5] sm:$0xff] %v140_v32 }

// kernel: walk_encoder_forward.4
= control target key start
LH: loop header
LB: loop body
LE: loop exit
PB: predicated region body
PF: predicated region fallthrough
CT: control target
= control target key end

     0   :  { %v756_v0 = vmov 0.0   ;;  %vm64_vm0 = vcmask 490496   ;;  %vm71_vm1 = vcmask 1043456   ;;  %s1251_s2 = inlined_call_operand.vmem [shape: f32[188,128], index: 2, kind: input, shape index: {}]   ;;  %s1252_s1 = inlined_call_operand.vmem [shape: f32[16,188], index: 1, kind: input, shape index: {}]   ;;  %s1253_s6 = inlined_call_operand.vmem [shape: f32[128,128], index: 6, kind: input, shape index: {}]   ;;  %s1254_s0 = inlined_call_operand.vmem [shape: f32[16,128], index: 0, kind: input, shape index: {}]   ;;  %s1255_s3 = inlined_call_operand.vmem [shape: f32[1,128], index: 3, kind: input, shape index: {}]   ;;  %s1256_s10 = inlined_call_operand.vmem [shape: f32[8,128], index: 10, kind: output, shape index: {1}]   ;;  %s1257_s7 = inlined_call_operand.vmem [shape: f32[9,128], index: 7, kind: input, shape index: {}]   ;;  %s1258_s4 = inlined_call_operand.vmem [shape: f32[1,128], index: 4, kind: input, shape index: {}]   ;;  %s1259_s5 = inlined_call_operand.vmem [shape: f32[1,128], index: 5, kind: input, shape index: {}]   ;;  %s1260_s8 = inlined_call_operand.vmem [shape: f32[1,128], index: 8, kind: input, shape index: {}]   ;;  %s1261_s9 = inlined_call_operand.vmem [shape: f32[16,128], index: 9, kind: output, shape index: {0}]  }
   0x1   :  { %75 = vmatprep.subr.mxu0 %v756_v0  ;;  %v55_v1 = vld [vmem:[%s1251_s2 + $0x78] sm:$0xff]  ;;  %v54_v2 = vld [vmem:[%s1251_s2 + $0x70] sm:$0xff]  ;;  %v53_v3 = vld [vmem:[%s1251_s2 + $0x68] sm:$0xff]  ;;  %610 = vst [vmem:[%s1256_s10] sm:$0xff] %v756_v0 }
   0x2   :  { %76 = vmatpush1.msra.mxu0 %v55_v1  ;;  %v52_v4 = vld [vmem:[%s1251_s2 + $0x60] sm:$0xff]  ;;  %v51_v5 = vld [vmem:[%s1251_s2 + $0x58] sm:$0xff]  ;;  %v50_v6 = vld [vmem:[%s1251_s2 + $0x50] sm:$0xff]  ;;  %v353_v1 = vlaneseq }
   0x3   :  { %77 = vmatprep.subr.mxu0 %v756_v0  ;;  %v37_v7 = vld [vmem:[%s1252_s1 + $0x8] sm:$0xff]  ;;  %v842_v8 = vld [vmem:[%s1253_s6 + $0x78] sm:$0xff]  ;;  %v847_v9 = vld [vmem:[%s1253_s6 + $0x70] sm:$0xff] }
   0x4   :  { %78 = vmatpush1.msra.mxu0 %v54_v2  ;;  %638 = vmatprep.mubr.msk.f32.mxu0 %vm64_vm0, %v37_v7  ;;  %v49_v10 = vld [vmem:[%s1251_s2 + $0x48] sm:$0xff]  ;;  %v48_v12 = vld [vmem:[%s1251_s2 + $0x40] sm:$0xff]  ;;  %v47_v14 = vld [vmem:[%s1251_s2 + $0x38] sm:$0xff] }
   0x5   :  { %79 = vmatprep.subr.mxu0 %v756_v0  ;;  %681 = vmatprep.subr.mxu1 %v842_v8  ;;  %v858_v11 = vld [vmem:[%s1253_s6 + $0x68] sm:$0xff]  ;;  %v869_v13 = vld [vmem:[%s1253_s6 + $0x60] sm:$0xff]  ;;  %v880_v15 = vld [vmem:[%s1253_s6 + $0x58] sm:$0xff] }
   0x6   :  { %80 = vmatpush1.msra.mxu0 %v53_v3  ;;  %682 = vmatpush3.msra.mxu1 %v842_v8  ;;  %v46_v16 = vld [vmem:[%s1251_s2 + $0x30] sm:$0xff]  ;;  %v45_v18 = vld [vmem:[%s1251_s2 + $0x28] sm:$0xff]  ;;  %v44_v20 = vld [vmem:[%s1251_s2 + $0x20] sm:$0xff] }
   0x7   :  { %81 = vmatprep.subr.mxu0 %v756_v0  ;;  %683 = vmatprep.subr.mxu1 %v847_v9  ;;  %v891_v17 = vld [vmem:[%s1253_s6 + $0x50] sm:$0xff]  ;;  %v902_v19 = vld [vmem:[%s1253_s6 + $0x48] sm:$0xff]  ;;  %v913_v21 = vld [vmem:[%s1253_s6 + $0x40] sm:$0xff] }
   0x8   :  { %82 = vmatpush1.msra.mxu0 %v52_v4  ;;  %684 = vmatpush3.msra.mxu1 %v847_v9  ;;  %v43_v22 = vld [vmem:[%s1251_s2 + $0x18] sm:$0xff]  ;;  %v42_v24 = vld [vmem:[%s1251_s2 + $0x10] sm:$0xff]  ;;  %v41_v26 = vld [vmem:[%s1251_s2 + $0x8] sm:$0xff]  ;;  %v1055_v4 = vshrl.u32 %v353_v1, 7 }
   0x9   :  { %83 = vmatprep.subr.mxu0 %v756_v0  ;;  %685 = vmatprep.subr.mxu1 %v858_v11  ;;  %v924_v23 = vld [vmem:[%s1253_s6 + $0x38] sm:$0xff]  ;;  %v935_v25 = vld [vmem:[%s1253_s6 + $0x30] sm:$0xff]  ;;  %v946_v27 = vld [vmem:[%s1253_s6 + $0x28] sm:$0xff] }
   0xa   :  { %84 = vmatpush1.msra.mxu0 %v51_v5  ;;  %686 = vmatpush3.msra.mxu1 %v858_v11  ;;  %v40_v28 = vld [vmem:[%s1251_s2] sm:$0xff]  ;;  %v63_v30 = vld [vmem:[%s1251_s2 + $0xb8] sm:$0xf]  ;;  %v62_v31 = vld [vmem:[%s1251_s2 + $0xb0] sm:$0xff]  ;;  %v355_v5 = vadd.s32 8, %v1055_v4  ;;  %vm390_vm2 = vcmp.lt.s32.totalorder %v1055_v4, 4 }
   0xb   :  { %85 = vmatprep.subr.mxu0 %v756_v0  ;;  %687 = vmatprep.subr.mxu1 %v869_v13  ;;  %v957_v29 = vld [vmem:[%s1253_s6 + $0x20] sm:$0xff]  ;;  %v61_v32 = vld [vmem:[%s1251_s2 + $0xa8] sm:$0xff]  ;;  %v59_v34 = vld [vmem:[%s1251_s2 + $0x98] sm:$0xff]  ;;  %vm417_vm3 = vcmp.lt.s32.totalorder %v1055_v4, 3  ;;  %vm444_vm8 = vcmp.lt.s32.totalorder %v1055_v4, 2  ;;  %vm471_vm9 = vcmp.lt.s32.totalorder %v1055_v4, 1 }
   0xc   :  { %86 = vmatpush1.msra.mxu0 %v50_v6  ;;  %688 = vmatpush3.msra.mxu1 %v869_v13  ;;  %v60_v33 = vld [vmem:[%s1251_s2 + $0xa0] sm:$0xff]  ;;  %v58_v35 = vld [vmem:[%s1251_s2 + $0x90] sm:$0xff]  ;;  %v57_v36 = vld [vmem:[%s1251_s2 + $0x88] sm:$0xff]  ;;  %v360_v6 = vand.u32 7, %v1055_v4  ;;  %v367_v7 = vand.u32 7, %v355_v5  ;;  %vm552_vm14 = vcmp.lt.s32.totalorder %v1055_v4, 5 }
   0xd   :  { %87 = vmatprep.subr.mxu0 %v756_v0  ;;  %689 = vmatprep.subr.mxu1 %v880_v15  ;;  %v56_v37 = vld [vmem:[%s1251_s2 + $0x80] sm:$0xff]  ;;  %v39_v39 = vld [vmem:[%s1252_s1 + $0x18] sm:$0xff]  ;;  %v38_v40 = vld [vmem:[%s1252_s1 + $0x10] sm:$0xff] }
   0xe   :  { %88 = vmatpush1.msra.mxu0 %v49_v10  ;;  %690 = vmatpush3.msra.mxu1 %v880_v15  ;;  %v36_v38 = vld [vmem:[%s1252_s1] sm:$0xff]  ;;  %v164_v41 = vld [vmem:[%s1253_s6 + $0x18] sm:$0xff]  ;;  %v163_v42 = vld [vmem:[%s1253_s6 + $0x10] sm:$0xff]  ;;  %v1064_v10 = vadd.s32 4294967292, %v360_v6 }
   0xf   :  { %89 = vmatprep.subr.mxu0 %v756_v0  ;;  %691 = vmatprep.subr.mxu1 %v891_v17  ;;  %v162_v43 = vld [vmem:[%s1253_s6 + $0x8] sm:$0xff]  ;;  %v161_v44 = vld [vmem:[%s1253_s6] sm:$0xff] }
  0x10   :  { %90 = vmatpush1.msra.mxu0 %v48_v12  ;;  %692 = vmatpush3.msra.mxu1 %v891_v17  ;;  %v34_v45 = vld [vmem:[%s1254_s0] sm:$0xff]  ;;  %v35_v50 = vld [vmem:[%s1254_s0 + $0x8] sm:$0xff]  ;;  %vm395_vm4 = vcmp.ge.s32.totalorder %v1064_v10, 0 }
  0x11   :  { %91 = vmatprep.subr.mxu0 %v756_v0  ;;  %693 = vmatprep.subr.mxu1 %v902_v19  ;;  %v640_v47 = vld [vmem:[%s1255_s3] ss:$0 sm:$0xff] }
  0x12   :  { %92 = vmatpush1.msra.mxu0 %v47_v14  ;;  %694 = vmatpush3.msra.mxu1 %v902_v19 }
  0x13   :  { %93 = vmatprep.subr.mxu0 %v756_v0  ;;  %695 = vmatprep.subr.mxu1 %v913_v21 }
  0x14   :  { %94 = vmatpush1.msra.mxu0 %v46_v16  ;;  %696 = vmatpush3.msra.mxu1 %v913_v21  ;;  %v1073_v16 = vadd.s32 4294967293, %v367_v7 }
  0x15   :  { %95 = vmatprep.subr.mxu0 %v756_v0  ;;  %697 = vmatprep.subr.mxu1 %v924_v23 }
  0x16   :  { %96 = vmatpush1.msra.mxu0 %v45_v18  ;;  %698 = vmatpush3.msra.mxu1 %v924_v23  ;;  %vm423_vm7 = vcmp.ge.s32.totalorder %v1073_v16, 0 }
  0x17   :  { %97 = vmatprep.subr.mxu0 %v756_v0  ;;  %699 = vmatprep.subr.mxu1 %v935_v25 }
  0x18   :  { %98 = vmatpush1.msra.mxu0 %v44_v20  ;;  %700 = vmatpush3.msra.mxu1 %v935_v25  ;;  %v1078_v20 = vadd.s32 4294967294, %v360_v6 }
  0x19   :  { %99 = vmatprep.subr.mxu0 %v756_v0  ;;  %701 = vmatprep.subr.mxu1 %v946_v27 }
  0x1a   :  { %100 = vmatpush1.msra.mxu0 %v43_v22  ;;  %702 = vmatpush3.msra.mxu1 %v946_v27  ;;  %vm449_vm10 = vcmp.ge.s32.totalorder %v1078_v20, 0 }
  0x1b   :  { %101 = vmatprep.subr.mxu0 %v756_v0  ;;  %703 = vmatprep.subr.mxu1 %v957_v29 }
  0x1c   :  { %102 = vmatpush1.msra.mxu0 %v42_v24  ;;  %704 = vmatpush3.msra.mxu1 %v957_v29  ;;  %v1086_v24 = vadd.s32 4294967294, %v367_v7 }
  0x1d   :  { %103 = vmatprep.subr.mxu0 %v756_v0  ;;  %705 = vmatprep.subr.mxu1 %v164_v41 }
  0x1e   :  { %104 = vmatpush1.msra.mxu0 %v41_v26  ;;  %706 = vmatpush3.msra.mxu1 %v164_v41  ;;  %v1090_v26 = vadd.s32 4294967295, %v367_v7  ;;  %vm450_vm11 = vcmp.ge.s32.totalorder %v1086_v24, 0 }
  0x1f   :  { %105 = vmatprep.subr.mxu0 %v756_v0  ;;  %707 = vmatprep.subr.mxu1 %v163_v42 }
  0x20   :  { %106 = vmatpush1.msra.mxu0 %v40_v28  ;;  %708 = vmatpush3.msra.mxu1 %v163_v42  ;;  %vm477_vm13 = vcmp.ge.s32.totalorder %v1090_v26, 0 }
  0x21   :  { %123 = vmatprep.subr.mxu0 %v756_v0  ;;  %709 = vmatprep.subr.mxu1 %v162_v43 }
  0x22   :  { %637 = vmatpush2.msk.msra.mxu0 %vm71_vm1, %v63_v30  ;;  %710 = vmatpush3.msra.mxu1 %v162_v43  ;;  %v517_v30 = vsub.s32 5, %v1055_v4 }
  0x23   :  { %125 = vmatprep.subr.mxu0 %v756_v0  ;;  %711 = vmatprep.subr.mxu1 %v161_v44 }
  0x24   :  { %126 = vmatpush2.msra.mxu0 %v62_v31  ;;  %712 = vmatpush3.msra.mxu1 %v161_v44  ;;  %v544_v31 = vsub.s32 6, %v1055_v4 }
  0x25   :  { %127 = vmatprep.subr.mxu0 %v756_v0  ;;  %716 = vmatprep.subr.mxu1 %v842_v8 }
  0x26   :  { %128 = vmatpush2.msra.mxu0 %v61_v32 }
  0x27   :  { %129 = vmatprep.subr.mxu0 %v756_v0 }
  0x28   :  { %130 = vmatpush2.msra.mxu0 %v60_v33  ;;  %v571_v33 = vsub.s32 7, %v1055_v4 }
  0x29   :  { %131 = vmatprep.subr.mxu0 %v756_v0 }
  0x2a   :  { %132 = vmatpush2.msra.mxu0 %v59_v34 }
  0x2b   :  { %133 = vmatprep.subr.mxu0 %v756_v0 }
  0x2c   :  { %134 = vmatpush2.msra.mxu0 %v58_v35 }
  0x2d   :  { %135 = vmatprep.subr.mxu0 %v756_v0 }
  0x2e   :  { %136 = vmatpush2.msra.mxu0 %v57_v36 }
  0x2f   :  { %137 = vmatprep.subr.mxu0 %v756_v0  ;;  %v380_v0 = vld [vmem:[%s1257_s7] sm:$0xff] }
  0x30   :  { %138 = vmatpush2.msra.mxu0 %v56_v37 }
  0x31   :  { %140 = vmatmul.mubr.f32.vlgmr.msra.gmra.mxu0 %v36_v38  ;;  %v1110_v38 = vadd.s32 1, %v360_v6 }
  0x32   :  { %639 = vmatprep.mubr.msk.f32.mxu0 %vm64_vm0, %v39_v39  ;;  %v1112_v39 = vadd.s32 1, %v367_v7 }
  0x33   :  { %vm505_vm0 = vcmp.le.s32.totalorder %v1110_v38, 7 }
  0x34   :  { %vm506_vm1 = vcmp.le.s32.totalorder %v1112_v39, 7 }
  0x35   :  { %145 = vmatmul.mubr.f32.gmra.mxu0 %v38_v40  ;;  %v1114_v40 = vadd.s32 2, %v360_v6 }
  0xf1   :  { %v141_v46 = vpop.f32.mrf.mxu0 }
  0xf2   :  { %v150_v48 = vadd.f32 %v141_v46, %v34_v45  ;;  %v1126_v45 = vadd.s32 3, %v367_v7  ;;  %v1128_v46 = vrot.slane %v380_v0, %v571_v33 }
  0xf3   :  { %v143_v49 = vpop.f32.mrf.mxu0 }
  0xf4   :  { %v159_v51 = vadd.f32 %v640_v47, %v150_v48  ;;  %v1132_v48 = vadd.s32 4, %v367_v7  ;;  %vm560_vm15 = vcmp.le.s32.totalorder %v1126_v45, 7  ;;  %v644_v45 = vld [vmem:[%s1260_s8] ss:$0 sm:$0xff] }
  0xf5   :  { %v146_v52 = vpop.f32.mrf.mxu0 }
  0xf6   :  { %v151_v53 = vadd.f32 %v146_v52, %v35_v50  ;;  %713 = vmatprep.mubr.f32.mxu1 %v159_v51 }
  0xf7   :  { %v148_v54 = vpop.f32.mrf.mxu0 }
  0xf8   :  { %v160_v55 = vadd.f32 %v640_v47, %v151_v53  ;;  %v1130_v47 = vadd.s32 4, %v360_v6 }
  0xfa   :  { %714 = vmatmul.mubr.f32.vlgmr.msra.gmra.mxu1 %v160_v55 }
  0xfb   :  { %717 = vmatpush3.msra.mxu1 %v842_v8  ;;  %v384_v8 = vsub.s32 4, %v1055_v4 }
  0xfc   :  { %718 = vmatprep.subr.mxu1 %v847_v9 }
  0xfd   :  { %719 = vmatpush3.msra.mxu1 %v847_v9  ;;  %v409_v9 = vsub.s32 0, %v1055_v4  ;;  %v385_v14 = vrot.slane %v380_v0, %v384_v8 }
  0xfe   :  { %720 = vmatprep.subr.mxu1 %v858_v11 }
  0xff   :  { %721 = vmatpush3.msra.mxu1 %v858_v11  ;;  %v1066_v11 = vadd.s32 4294967292, %v367_v7 }
 0x100   :  { %722 = vmatprep.subr.mxu1 %v869_v13 }
 0x101   :  { %723 = vmatpush3.msra.mxu1 %v869_v13  ;;  %v641_v13 = vld [vmem:[%s1258_s4] ss:$0 sm:$0xff]  ;;  %vm396_vm5 = vcmp.ge.s32.totalorder %v1066_v11, 0 }
 0x102   :  { %724 = vmatprep.subr.mxu1 %v880_v15 }
 0x103   :  { %725 = vmatpush3.msra.mxu1 %v880_v15  ;;  %v1071_v15 = vadd.s32 4294967293, %v360_v6 }
 0x104   :  { %726 = vmatprep.subr.mxu1 %v891_v17 }
 0x105   :  { %727 = vmatpush3.msra.mxu1 %v891_v17  ;;  %v436_v17 = vsub.s32 1, %v1055_v4  ;;  %vm422_vm6 = vcmp.ge.s32.totalorder %v1071_v15, 0 }
 0x106   :  { %728 = vmatprep.subr.mxu1 %v902_v19 }
 0x107   :  { %729 = vmatpush3.msra.mxu1 %v902_v19  ;;  %v1076_v19 = vrot.slane %v380_v0, %v409_v9  ;;  %v437_v32 = vrot.slane %v380_v0, %v436_v17 }
 0x108   :  { %730 = vmatprep.subr.mxu1 %v913_v21 }
 0x109   :  { %731 = vmatpush3.msra.mxu1 %v913_v21  ;;  %v463_v21 = vsub.s32 2, %v1055_v4 }
 0x10a   :  { %732 = vmatprep.subr.mxu1 %v924_v23 }
 0x10b   :  { %733 = vmatpush3.msra.mxu1 %v924_v23  ;;  %v642_v23 = vld [vmem:[%s1259_s5] ss:$0 sm:$0xff]  ;;  %v1103_v36 = vrot.slane %v380_v0, %v463_v21 }
 0x10c   :  { %734 = vmatprep.subr.mxu1 %v935_v25 }
 0x10d   :  { %735 = vmatpush3.msra.mxu1 %v935_v25  ;;  %v1088_v25 = vadd.s32 4294967295, %v360_v6 }
 0x10e   :  { %736 = vmatprep.subr.mxu1 %v946_v27 }
 0x10f   :  { %737 = vmatpush3.msra.mxu1 %v946_v27  ;;  %v490_v27 = vsub.s32 3, %v1055_v4  ;;  %vm476_vm12 = vcmp.ge.s32.totalorder %v1088_v25, 0 }
 0x110   :  { %738 = vmatprep.subr.mxu1 %v957_v29 }
 0x111   :  { %739 = vmatpush3.msra.mxu1 %v957_v29  ;;  %v1108_v37 = vrot.slane %v380_v0, %v490_v27 }
 0x112   :  { %740 = vmatprep.subr.mxu1 %v164_v41 }
 0x113   :  { %741 = vmatpush3.msra.mxu1 %v164_v41  ;;  %v1118_v41 = vrot.slane %v380_v0, %v517_v30 }
 0x114   :  { %742 = vmatprep.subr.mxu1 %v163_v42 }
 0x115   :  { %743 = vmatpush3.msra.mxu1 %v163_v42  ;;  %v1120_v42 = vadd.s32 2, %v367_v7 }
 0x116   :  { %744 = vmatprep.subr.mxu1 %v162_v43 }
 0x117   :  { %745 = vmatpush3.msra.mxu1 %v162_v43  ;;  %v1122_v43 = vrot.slane %v380_v0, %v544_v31 }
 0x118   :  { %746 = vmatprep.subr.mxu1 %v161_v44 }
 0x119   :  { %747 = vmatpush3.msra.mxu1 %v161_v44  ;;  %v1124_v44 = vadd.s32 3, %v360_v6 }
 0x1ba   :  { %v715_v56 = vpop.f32.mrf.mxu1 }
 0x1bb   :  { %v253_v57 = vsub.f32 %v160_v55, %v715_v56 }
 0x1bc   :  { %v243_v58 = vpop.f32.mrf.mxu1 }
 0x1bd   :  { %v252_v59 = vsub.f32 %v159_v51, %v243_v58  ;;  %v255_v61 = vmul.f32 %v253_v57, %v253_v57 }
 0x1bf   :  { %v254_v60 = vmul.f32 %v252_v59, %v252_v59 }
 0x1c1   :  { %748 = vmatprep.mubr.f32.mxu1 %v254_v60 }
 0x1c2   :  { %749 = vmatmul.mubr.f32.vlgmr.msra.gmra.mxu1 %v255_v61 }
 0x282   :  { %v750_v62 = vpop.f32.mrf.mxu1 }
 0x283   :  { %v328_v63 = vadd.f32 1e-05, %v750_v62 }
 0x284   :  { %v322_v2 = vpop.f32.mrf.mxu1 }
 0x285   :  { %752 = vrsqrt.f32 %v328_v63  ;;  %v323_v3 = vadd.f32 1e-05, %v322_v2 }
 0x287   :  { %754 = vrsqrt.f32 %v323_v3 }
 0x292   :  { %v753_v12 = vpop.eup %752 }
 0x293   :  { %v334_v18 = vmul.f32 %v753_v12, %v253_v57 }
 0x294   :  { %v755_v22 = vpop.eup %754 }
 0x295   :  { %v343_v28 = vmul.f32 %v641_v13, %v334_v18  ;;  %v333_v29 = vmul.f32 %v755_v22, %v252_v59 }
 0x297   :  { %v1100_v34 = vadd.f32 %v642_v23, %v343_v28  ;;  %v342_v35 = vmul.f32 %v641_v13, %v333_v29 }
 0x299   :  { %v387_v49 = vmul.f32 %v385_v14, %v1100_v34  ;;  %v389_v50 = vrot.slane %v1100_v34, 4  ;;  %v416_v51 = vrot.slane %v1100_v34, 5  ;;  %v1137_v52 = vadd.f32 %v642_v23, %v342_v35 }
 0x29a   :  { %v443_v53 = vrot.slane %v1100_v34, 6  ;;  %v470_v54 = vrot.slane %v1100_v34, 7  ;;  %v497_v55 = vrot.slane %v1100_v34, 1  ;;  %v524_v56 = vrot.slane %v1100_v34, 2 }
 0x29b   :  { %v386_v57 = vmul.f32 %v385_v14, %v1137_v52  ;;  %v388_v58 = vrot.slane %v1137_v52, 4  ;;  %v415_v59 = vrot.slane %v1137_v52, 5  ;;  %v442_v60 = vrot.slane %v1137_v52, 6 }
 0x29c   :  { %v469_v61 = vrot.slane %v1137_v52, 7  ;;  %v496_v62 = vrot.slane %v1137_v52, 1  ;;  %v523_v63 = vrot.slane %v1137_v52, 2  ;;  %v550_v1 = vrot.slane %v1137_v52, 3 }
 0x29d   :  { %v391_v2 = vsel %vm390_vm2, %v388_v58, %v389_v50  ;;  %v392_v3 = vsel %vm390_vm2, %v389_v50, %v388_v58  ;;  %v418_v5 = vsel %vm417_vm3, %v415_v59, %v416_v51  ;;  %v419_v6 = vsel %vm417_vm3, %v416_v51, %v415_v59 }
 0x29e   :  { %v405_v7 = vsel %vm395_vm4, %v392_v3, 0.0  ;;  %v406_v8 = vsel %vm396_vm5, %v391_v2, 0.0  ;;  %v432_v0 = vsel %vm422_vm6, %v419_v6, 0.0  ;;  %v433_v9 = vsel %vm423_vm7, %v418_v5, 0.0 }
 0x29f   :  { %vm559_vm2 = vcmp.le.s32.totalorder %v1124_v44, 7  ;;  %v411_v12 = vmul.f32 %v1076_v19, %v405_v7  ;;  %v412_v13 = vmul.f32 %v1076_v19, %v406_v8  ;;  %v438_v14 = vmul.f32 %v437_v32, %v432_v0 }
 0x2a0   :  { %v439_v10 = vmul.f32 %v437_v32, %v433_v9  ;;  %vm581_vm3 = vcmp.le.s32.totalorder %v1130_v47, 7  ;;  %v445_v11 = vsel %vm444_vm8, %v442_v60, %v443_v53  ;;  %v446_v15 = vsel %vm444_vm8, %v443_v53, %v442_v60 }
 0x2a1   :  { %v472_v16 = vsel %vm471_vm9, %v469_v61, %v470_v54  ;;  %v473_v17 = vsel %vm471_vm9, %v470_v54, %v469_v61  ;;  %v413_v18 = vadd.f32 %v411_v12, %v386_v57  ;;  %v414_v21 = vadd.f32 %v412_v13, %v387_v49 }
 0x2a2   :  { %v459_v19 = vsel %vm449_vm10, %v446_v15, 0.0  ;;  %v460_v22 = vsel %vm450_vm11, %v445_v11, 0.0  ;;  %v486_v28 = vsel %vm476_vm12, %v473_v17, 0.0  ;;  %v487_v29 = vsel %vm477_vm13, %v472_v16, 0.0 }
 0x2a3   :  { %v465_v23 = vmul.f32 %v1103_v36, %v459_v19  ;;  %v466_v27 = vmul.f32 %v1103_v36, %v460_v22  ;;  %v440_v30 = vadd.f32 %v438_v14, %v413_v18  ;;  %v441_v31 = vadd.f32 %v439_v10, %v414_v21 }
 0x2a4   :  { %v492_v32 = vmul.f32 %v1108_v37, %v486_v28  ;;  %v493_v20 = vmul.f32 %v1108_v37, %v487_v29  ;;  %vm1262_vm4 = vcmp.lt.s32.totalorder %v1055_v4, 7  ;;  %vm1264_vm6 = vcmp.lt.s32.totalorder %v1055_v4, 6 }
 0x2a5   :  { %v499_v24 = vsel %vm1262_vm4, %v496_v62, %v497_v55  ;;  %vm1263_vm5 = vmmov %vm1262_vm4  ;;  %v526_v35 = vsel %vm1264_vm6, %v523_v63, %v524_v56  ;;  %v467_v26 = vadd.f32 %v465_v23, %v440_v30  ;;  %v468_v36 = vadd.f32 %v466_v27, %v441_v31 }
 0x2a6   :  { %v500_v33 = vsel %vm1263_vm5, %v497_v55, %v496_v62  ;;  %vm1265_vm7 = vmmov %vm1264_vm6  ;;  %v513_v49 = vsel %vm505_vm0, %v499_v24, 0.0  ;;  %v551_v50 = vrot.slane %v1100_v34, 3  ;;  %vm1266_vm8 = vcmp.le.s32.totalorder %v1114_v40, 7 }
 0x2a7   :  { %v527_v25 = vsel %vm1265_vm7, %v524_v56, %v523_v63  ;;  %v514_v37 = vsel %vm506_vm1, %v500_v33, 0.0  ;;  %v540_v51 = vsel %vm1266_vm8, %v526_v35, 0.0  ;;  %vm1267_vm9 = vcmp.le.s32.totalorder %v1120_v42, 7 }
 0x2a8   :  { %v541_v52 = vsel %vm1267_vm9, %v527_v25, 0.0  ;;  %vm582_vm10 = vcmp.le.s32.totalorder %v1132_v48, 7  ;;  %v494_v53 = vadd.f32 %v492_v32, %v467_v26  ;;  %v495_v54 = vadd.f32 %v493_v20, %v468_v36 }
 0x2a9   :  { %v519_v55 = vmul.f32 %v1118_v41, %v513_v49  ;;  %v520_v38 = vmul.f32 %v1118_v41, %v514_v37  ;;  %v546_v56 = vmul.f32 %v1122_v43, %v540_v51  ;;  %v547_v39 = vmul.f32 %v1122_v43, %v541_v52  ;;  %v643_v41 = vld [vmem:[%s1257_s7 + $0x8] ss:$0 sm:$0xff] }
 0x2aa   :  { %v553_v34 = vsel %vm552_vm14, %v550_v1, %v551_v50  ;;  %v554_v40 = vsel %vm552_vm14, %v551_v50, %v550_v1  ;;  %v589_v43 = vsel %vm581_vm3, %v391_v2, 0.0  ;;  %v590_v59 = vsel %vm582_vm10, %v392_v3, 0.0 }
 0x2ab   :  { %v521_v42 = vadd.f32 %v519_v55, %v494_v53  ;;  %v522_v57 = vadd.f32 %v520_v38, %v495_v54  ;;  %v567_v48 = vsel %vm559_vm2, %v553_v34, 0.0  ;;  %v568_v58 = vsel %vm560_vm15, %v554_v40, 0.0 }
 0x2ac   :  { %v573_v4 = vmul.f32 %v1128_v46, %v567_v48  ;;  %v574_v62 = vmul.f32 %v1128_v46, %v568_v58  ;;  %v595_v1 = vmul.f32 %v643_v41, %v589_v43  ;;  %v596_v5 = vmul.f32 %v643_v41, %v590_v59 }
 0x2ad   :  { %v548_v60 = vadd.f32 %v546_v56, %v521_v42  ;;  %v549_v61 = vadd.f32 %v547_v39, %v522_v57 }
 0x2af   :  { %v575_v63 = vadd.f32 %v573_v4, %v548_v60  ;;  %v576_v44 = vadd.f32 %v574_v62, %v549_v61 }
 0x2b1   :  { %v597_v6 = vadd.f32 %v595_v1, %v575_v63  ;;  %v598_v7 = vadd.f32 %v596_v5, %v576_v44 }
 0x2b3   :  { %v606_v8 = vadd.f32 %v644_v45, %v597_v6  ;;  %v607_v47 = vadd.f32 %v644_v45, %v598_v7 }
 0x2b5   :  { %608 = vst [vmem:[%s1261_s9] sm:$0xff] %v606_v8  ;;  %609 = vst [vmem:[%s1261_s9 + $0x8] sm:$0xff] %v607_v47  ;;  %v611_v46 = vadd.f32 %v607_v47, %v606_v8  ;;  %v619_v2 = vmul.f32 %v606_v8, %v606_v8  ;;  %v620_v3 = vmul.f32 %v607_v47, %v607_v47 }
 0x2b7   :  { %v612_v0 = vrot.slane %v611_v46, 4  ;;  %v621_v9 = vadd.f32 %v620_v3, %v619_v2 }
 0x2b9   :  { %v613_v12 = vadd.f32 %v612_v0, %v611_v46  ;;  %v622_v13 = vrot.slane %v621_v9, 4 }
 0x2bb   :  { %v614_v14 = vrot.slane %v613_v12, 2  ;;  %v623_v10 = vadd.f32 %v622_v13, %v621_v9 }
 0x2bd   :  { %v615_v11 = vadd.f32 %v614_v14, %v613_v12  ;;  %v624_v15 = vrot.slane %v623_v10, 2 }
 0x2bf   :  { %v616_v16 = vrot.slane %v615_v11, 1  ;;  %v625_v17 = vadd.f32 %v624_v15, %v623_v10 }
 0x2c1   :  { %v617_v18 = vadd.f32 %v616_v16, %v615_v11  ;;  %v626_v21 = vrot.slane %v625_v17, 1 }
 0x2c3   :  { %618 = vst [vmem:[%s1256_s10] sm:$0x1] %v617_v18  ;;  %v627_v19 = vadd.f32 %v626_v21, %v625_v17 }
 0x2c5   :  { %628 = vst [vmem:[%s1256_s10 + $0x1] sm:$0x1] %v627_v19 }

// kernel: walk_encoder_forward.7
= control target key start
LH: loop header
LB: loop body
LE: loop exit
PB: predicated region body
PF: predicated region fallthrough
CT: control target
= control target key end

     0   :  { %v605_v1 = vmov 0.0   ;;  %vm606_vm0 = vmmov 0   ;;  %vm40_vm1 = vcmask 261120   ;;  %v607_v3 = vmov 0   ;;  %s811_s0 = inlined_call_operand.vmem [shape: bf16[24,64], index: 0, kind: input, shape index: {}]   ;;  %s812_s1 = inlined_call_operand.vmem [shape: f32[64,32], index: 1, kind: input, shape index: {}]   ;;  %s813_s2 = inlined_call_operand.vmem [shape: f32[24,1], index: 2, kind: input, shape index: {}]   ;;  %s814_s3 = inlined_call_operand.vmem [shape: f32[24,32], index: 3, kind: input, shape index: {}]   ;;  %s815_s4 = inlined_call_operand.vmem [shape: f32[32,32], index: 4, kind: input, shape index: {}]   ;;  %s816_s5 = inlined_call_operand.vmem [shape: f32[1,32], index: 5, kind: input, shape index: {}]   ;;  %s817_s6 = inlined_call_operand.vmem [shape: f32[1,32], index: 6, kind: input, shape index: {}]   ;;  %s818_s7 = inlined_call_operand.vmem [shape: f32[1,32], index: 7, kind: input, shape index: {}]   ;;  %s819_s8 = inlined_call_operand.vmem [shape: f32[32,32], index: 8, kind: input, shape index: {}]   ;;  %s820_s9 = inlined_call_operand.vmem [shape: f32[1,32], index: 9, kind: input, shape index: {}]   ;;  %s821_s10 = inlined_call_operand.hbm [shape: f32[24,32], index: 10, kind: output, shape index: {}]  }
   0x1   :  { %v60_v0 = vld [vmem:[%s812_s1 + $0x38] sm:$0xff]  ;;  %514 = vmatprep.subr.mxu0 %v605_v1  ;;  %v59_v2 = vld [vmem:[%s812_s1 + $0x30] sm:$0xff]  ;;  %530 = vmatprep.mubr.msk.f32.mxu0 %vm606_vm0, %v605_v1  ;;  %41 = vst.msk [vmem:[#allocation2] sm:$0xff] %vm40_vm1, %v605_v1  ;;  %42 = vst.msk [vmem:[#allocation2 + $0x8] sm:$0xff] %vm40_vm1, %v605_v1 }
   0x2   :  { %515 = vmatpush3.msra.mxu0 %v60_v0  ;;  %579 = vset.pattern.permute.xlu0 %v607_v3  ;;  %43 = vst.msk [vmem:[#allocation2 + $0x10] sm:$0xff] %vm40_vm1, %v605_v1  ;;  %v58_v4 = vld [vmem:[%s812_s1 + $0x28] sm:$0xff]  ;;  %v164_v5 = vld [vmem:[%s813_s2] sm:$0xff]  ;;  %v166_v6 = vld [vmem:[%s813_s2 + $0x10] sm:$0xff] }
   0x3   :  { %516 = vmatprep.subr.mxu0 %v605_v1  ;;  %580 = vset.pattern.permute.xlu1 %v607_v3 }
   0x4   :  { %517 = vmatpush3.msra.mxu0 %v59_v2  ;;  %169 = vperm.xlu0 %579, %v164_v5  }
   0x5   :  { %15 = vsyncpa [#allocation4], 0  ;;  %518 = vmatprep.subr.mxu0 %v605_v1  ;;  %v57_v7 = vld [vmem:[%s812_s1 + $0x20] sm:$0xff]  ;;  %v165_v8 = vld [vmem:[%s813_s2 + $0x8] sm:$0xff]  ;;  %179 = vperm.xlu1 %580, %v166_v6   ;;  %vm61_vm2 = vcmask 523264   ;;  %s608_s19 = smov [#allocation3]  }
   0x6   :  { %519 = vmatpush3.msra.mxu0 %v58_v4  ;;  %539 = vmatprep.subr.mxu1 %v605_v1  ;;  %v56_v9 = vld [vmem:[%s812_s1 + $0x18] sm:$0xff]  ;;  %v55_v10 = vld [vmem:[%s812_s1 + $0x10] sm:$0xff]  ;;  %v486_v11 = vld [vmem:[%s811_s0] sm:$0xff]   ;;  %s461_s20 = sshll.u32 %s608_s19, 4  ;;  %s462_s20 = int_to_ptr.vmem [resolvable:$true] %s461_s20 }
   0x7   :  { %520 = vmatprep.subr.mxu0 %v605_v1  ;;  %547 = vmatprep.mubr.msk.f32.mxu1 %vm606_vm0, %v605_v1  ;;  %v54_v12 = vld [vmem:[%s812_s1 + $0x8] sm:$0xff]  ;;  %v53_v13 = vld [vmem:[%s812_s1] sm:$0xff]  ;;  %v487_v14 = vunpack.c.l.bf16 %v486_v11  ;;  %v488_v15 = vunpack.c.h.bf16 %v486_v11  ;;  %v188_v18 = vld [vmem:[%s815_s4 + $0x18] sm:$0xff]  ;;  %p588_p1 = scmp.lt.s32.totalorder %s462_s20, %s462_s20 }
   0x8   :  { %521 = vmatpush3.msra.mxu0 %v57_v7  ;;  %174 = vperm.xlu0 %579, %v165_v8   ;;  %v49_v16 = vld [vmem:[%s811_s0 + $0x8] sm:$0xf]  ;;  %v187_v19 = vld [vmem:[%s815_s4 + $0x10] sm:$0xff]  ;;  %v185_v21 = vld [vmem:[%s815_s4] sm:$0xff] }
   0x9   :  { %522 = vmatprep.subr.mxu0 %v605_v1  ;;  %v52_v17 = vunpack.c.l.bf16 %v49_v16  ;;  %540 = vmatpush3.msra.mxu1 %v188_v18  ;;  %v186_v20 = vld [vmem:[%s815_s4 + $0x8] sm:$0xff]  ;;  %v44_v22 = vld [vmem:[#allocation2] sm:$0xff]  ;;  %v46_v30 = vld [vmem:[#allocation2 + $0x10] sm:$0xff] }
   0xa   :  { %523 = vmatpush3.msra.mxu0 %v56_v9  ;;  %541 = vmatprep.subr.mxu1 %v605_v1  ;;  %v45_v26 = vld [vmem:[#allocation2 + $0x8] sm:$0xff]  ;;  %v350_v43 = vld [vmem:[%s819_s8 + $0x18] sm:$0xff]  ;;  %v349_v44 = vld [vmem:[%s819_s8 + $0x10] sm:$0xff] }
   0xb   :  { %524 = vmatprep.subr.mxu0 %v605_v1  ;;  %542 = vmatpush3.msra.mxu1 %v187_v19  ;;  %v348_v45 = vld [vmem:[%s819_s8 + $0x8] sm:$0xff]  ;;  %v347_v46 = vld [vmem:[%s819_s8] sm:$0xff] }
   0xc   :  { %525 = vmatpush3.msra.mxu0 %v55_v10  ;;  %543 = vmatprep.subr.mxu1 %v605_v1  ;;  %v475_v48 = vld [vmem:[%s816_s5] ss:$0 sm:$0xff] }
   0xd   :  { %526 = vmatprep.subr.mxu0 %v605_v1  ;;  %544 = vmatpush3.msra.mxu1 %v186_v20 }
   0xe   :  { %527 = vmatpush3.msra.mxu0 %v54_v12  ;;  %545 = vmatprep.subr.mxu1 %v605_v1 }
   0xf   :  { %528 = vmatprep.subr.mxu0 %v605_v1  ;;  %546 = vmatpush3.msra.mxu1 %v185_v21 }
  0x10   :  { %529 = vmatpush3.msra.mxu0 %v53_v13  ;;  %556 = vmatprep.subr.mxu1 %v605_v1 }
  0x11   :  { %531 = vmatmul.mubr.msk.f32.vlgmr.msra.gmra.mxu0 %vm61_vm2, %v487_v14 }
  0x12   :  { %533 = vmatprep.mubr.msk.f32.mxu0 %vm606_vm0, %v605_v1 }
  0x15   :  { %534 = vmatmul.mubr.msk.f32.gmra.mxu0 %vm61_vm2, %v488_v15 }
  0x16   :  { %536 = vmatprep.mubr.msk.f32.mxu0 %vm606_vm0, %v605_v1 }
  0x19   :  { %537 = vmatmul.mubr.msk.f32.gmra.mxu0 %vm61_vm2, %v52_v17 }
  0x7f   :  { %v170_v31 = vpop.permute.xlu0 %169 }
  0x80   :  { %v180_v40 = vpop.permute.xlu1 %179 }
  0x83   :  { %v175_v37 = vpop.permute.xlu0 %174 }
  0xd1   :  { %v137_v23 = vpop.f32.mrf.mxu0 }
  0xd2   :  { %v151_v24 = vadd.f32 %v137_v23, %v44_v22 }
  0xd3   :  { %v532_v25 = vpop.f32.mrf.mxu0 }
  0xd4   :  { %155 = vst.msk [vmem:[#allocation2] sm:$0xff] %vm40_vm1, %v151_v24 }
  0xd5   :  { %v142_v27 = vpop.f32.mrf.mxu0 }
  0xd6   :  { %v152_v28 = vadd.f32 %v142_v27, %v45_v26  ;;  %v479_v26 = vld [vmem:[%s817_s6] ss:$0 sm:$0xff] }
  0xd7   :  { %v535_v29 = vpop.f32.mrf.mxu0 }
  0xd8   :  { %156 = vst.msk [vmem:[#allocation2 + $0x8] sm:$0xff] %vm40_vm1, %v152_v28  ;;  %v480_v29 = vld [vmem:[%s818_s7] ss:$0 sm:$0xff] }
  0xd9   :  { %v147_v32 = vpop.f32.mrf.mxu0 }
  0xda   :  { %v153_v33 = vadd.f32 %v147_v32, %v46_v30 }
  0xdb   :  { %v161_v34 = vld [vmem:[#allocation2] sm:$0xff]  ;;  %v538_v35 = vpop.f32.mrf.mxu0 }
  0xdc   :  { %v182_v36 = vmul.f32 %v170_v31, %v161_v34  ;;  %157 = vst.msk [vmem:[#allocation2 + $0x10] sm:$0xff] %vm40_vm1, %v153_v33 }
  0xde   :  { %548 = vmatmul.mubr.msk.f32.vlgmr.msra.gmra.mxu1 %vm40_vm1, %v182_v36 }
  0xdf   :  { %v162_v38 = vld [vmem:[#allocation2 + $0x8] sm:$0xff]  ;;  %550 = vmatprep.mubr.msk.f32.mxu1 %vm606_vm0, %v605_v1  ;;  %557 = vmatpush3.msra.mxu1 %v350_v43 }
  0xe0   :  { %v183_v39 = vmul.f32 %v175_v37, %v162_v38  ;;  %558 = vmatprep.subr.mxu1 %v605_v1 }
  0xe1   :  { %559 = vmatpush3.msra.mxu1 %v349_v44 }
  0xe2   :  { %551 = vmatmul.mubr.msk.f32.gmra.mxu1 %vm40_vm1, %v183_v39  ;;  %560 = vmatprep.subr.mxu1 %v605_v1 }
  0xe3   :  { %v163_v41 = vld [vmem:[#allocation2 + $0x10] sm:$0xff]  ;;  %553 = vmatprep.mubr.msk.f32.mxu1 %vm606_vm0, %v605_v1  ;;  %561 = vmatpush3.msra.mxu1 %v348_v45  ;;  %v345_v45 = vld [vmem:[%s814_s3 + $0x8] sm:$0xff] }
  0xe4   :  { %v184_v42 = vmul.f32 %v180_v40, %v163_v41  ;;  %562 = vmatprep.subr.mxu1 %v605_v1  ;;  %v344_v40 = vld [vmem:[%s814_s3] sm:$0xff] }
  0xe5   :  { %563 = vmatpush3.msra.mxu1 %v347_v46 }
  0xe6   :  { %554 = vmatmul.mubr.msk.f32.gmra.mxu1 %vm40_vm1, %v184_v42  ;;  %v484_v42 = vld [vmem:[%s820_s9] ss:$0 sm:$0xff]  ;;  %s583_s9 = scalar_lea.vmem %s462_s20, 384 }
  0xe7   :  { %564 = vmatprep.mubr.msk.f32.mxu1 %vm606_vm0, %v605_v1  ;;  %p584_p0 = scmp.ne.s32.totalorder %s462_s20, %s583_s9  ;;  %p589_p2 = scmp.lt.s32.totalorder %s583_s9, %s583_s9 }
  0xe9   :  { %p590_p3 = por %p589_p2, %p588_p1 }
  0xeb   :  { %p591_p4 = pnand %p590_p3, %p584_p0 }
 0x19e   :  { %v271_v47 = vpop.f32.mrf.mxu1 }
 0x19f   :  { %v272_v51 = vadd.f32 %v475_v48, %v271_v47 }
 0x1a0   :  { %v549_v49 = vpop.f32.mrf.mxu1 }
 0x1a1   :  { %v285_v56 = vsel %vm40_vm1, %v272_v51, 0.0  ;;  %v346_v49 = vld [vmem:[%s814_s3 + $0x10] sm:$0xff] }
 0x1a2   :  { %v276_v50 = vpop.f32.mrf.mxu1 }
 0x1a3   :  { %v277_v52 = vadd.f32 %v475_v48, %v276_v50 }
 0x1a4   :  { %v552_v53 = vpop.f32.mrf.mxu1 }
 0x1a5   :  { %v286_v54 = vsel %vm40_vm1, %v277_v52, 0.0 }
 0x1a6   :  { %v281_v55 = vpop.f32.mrf.mxu1  ;;  %v287_v58 = vadd.f32 %v286_v54, %v285_v56 }
 0x1a7   :  { %v282_v57 = vadd.f32 %v475_v48, %v281_v55 }
 0x1a8   :  { %v555_v59 = vpop.f32.mrf.mxu1 }
 0x1a9   :  { %v288_v60 = vsel %vm40_vm1, %v282_v57, 0.0 }
 0x1aa   :  { %v289_v61 = vadd.f32 %v288_v60, %v287_v58 }
 0x1ac   :  { %v290_v62 = vrot.slane %v289_v61, 4 }
 0x1ae   :  { %v291_v63 = vadd.f32 %v290_v62, %v289_v61 }
 0x1b0   :  { %v292_v0 = vrot.slane %v291_v63, 2 }
 0x1b2   :  { %v293_v2 = vadd.f32 %v292_v0, %v291_v63 }
 0x1b4   :  { %v294_v3 = vrot.slane %v293_v2, 1 }
 0x1b6   :  { %v295_v4 = vadd.f32 %v294_v3, %v293_v2 }
 0x1b8   :  { %v297_v5 = vmul.f32 0.041666668, %v295_v4 }
 0x1ba   :  { %v298_v6 = vsub.f32 %v272_v51, %v297_v5  ;;  %v299_v7 = vsub.f32 %v277_v52, %v297_v5  ;;  %v300_v8 = vsub.f32 %v282_v57, %v297_v5 }
 0x1bc   :  { %v301_v9 = vmul.f32 %v298_v6, %v298_v6  ;;  %v302_v10 = vmul.f32 %v299_v7, %v299_v7  ;;  %v303_v11 = vmul.f32 %v300_v8, %v300_v8 }
 0x1be   :  { %v304_v12 = vsel %vm40_vm1, %v301_v9, 0.0  ;;  %v305_v13 = vsel %vm40_vm1, %v302_v10, 0.0  ;;  %v307_v15 = vsel %vm40_vm1, %v303_v11, 0.0 }
 0x1bf   :  { %v306_v14 = vadd.f32 %v305_v13, %v304_v12 }
 0x1c1   :  { %v308_v16 = vadd.f32 %v307_v15, %v306_v14 }
 0x1c3   :  { %v309_v17 = vrot.slane %v308_v16, 4 }
 0x1c5   :  { %v310_v18 = vadd.f32 %v309_v17, %v308_v16 }
 0x1c7   :  { %v311_v19 = vrot.slane %v310_v18, 2 }
 0x1c9   :  { %v312_v20 = vadd.f32 %v311_v19, %v310_v18 }
 0x1cb   :  { %v313_v21 = vrot.slane %v312_v20, 1 }
 0x1cd   :  { %v314_v22 = vadd.f32 %v313_v21, %v312_v20 }
 0x1cf   :  { %v315_v23 = vmul.f32 0.041666668, %v314_v22 }
 0x1d1   :  { %v316_v24 = vadd.f32 1e-05, %v315_v23 }
 0x1d3   :  { %581 = vrsqrt.f32 %v316_v24 }
 0x1e0   :  { %v582_v25 = vpop.eup %581 }
 0x1e1   :  { %v318_v27 = vmul.f32 %v582_v25, %v298_v6  ;;  %v319_v28 = vmul.f32 %v582_v25, %v299_v7  ;;  %v320_v30 = vmul.f32 %v582_v25, %v300_v8 }
 0x1e3   :  { %v328_v31 = vmul.f32 %v479_v26, %v318_v27  ;;  %v329_v32 = vmul.f32 %v479_v26, %v319_v28  ;;  %v330_v34 = vmul.f32 %v479_v26, %v320_v30 }
 0x1e5   :  { %v338_v33 = vadd.f32 %v480_v29, %v328_v31  ;;  %v339_v36 = vadd.f32 %v480_v29, %v329_v32  ;;  %v340_v38 = vadd.f32 %v480_v29, %v330_v34 }
 0x1e7   :  { %v341_v35 = vmax.f32 %v338_v33, 0.0  ;;  %v342_v37 = vmax.f32 %v339_v36, 0.0  ;;  %v343_v39 = vmax.f32 %v340_v38, 0.0 }
 0x1e9   :  { %565 = vmatmul.mubr.msk.f32.vlgmr.msra.gmra.mxu1 %vm40_vm1, %v341_v35 }
 0x1ea   :  { %567 = vmatprep.mubr.msk.f32.mxu1 %vm606_vm0, %v605_v1 }
 0x1ed   :  { %568 = vmatmul.mubr.msk.f32.gmra.mxu1 %vm40_vm1, %v342_v37 }
 0x1ee   :  { %570 = vmatprep.mubr.msk.f32.mxu1 %vm606_vm0, %v605_v1 }
 0x1f1   :  { %571 = vmatmul.mubr.msk.f32.gmra.mxu1 %vm40_vm1, %v343_v39 }
 0x2a9   :  { %v426_v41 = vpop.f32.mrf.mxu1 }
 0x2aa   :  { %v440_v43 = vadd.f32 %v426_v41, %v344_v40 }
 0x2ab   :  { %v566_v44 = vpop.f32.mrf.mxu1 }
 0x2ac   :  { %v450_v46 = vadd.f32 %v484_v42, %v440_v43 }
 0x2ad   :  { %v431_v1 = vpop.f32.mrf.mxu1 }
 0x2ae   :  { %453 = vst.msk [vmem:[#allocation3] sm:$0xff] %vm40_vm1, %v450_v46  ;;  %v441_v47 = vadd.f32 %v431_v1, %v345_v45 }
 0x2af   :  { %v569_v48 = vpop.f32.mrf.mxu1 }
 0x2b0   :  { %v451_v50 = vadd.f32 %v484_v42, %v441_v47 }
 0x2b1   :  { %v436_v51 = vpop.f32.mrf.mxu1 }
 0x2b2   :  { %454 = vst.msk [vmem:[#allocation3 + $0x8] sm:$0xff] %vm40_vm1, %v451_v50  ;;  %v442_v52 = vadd.f32 %v436_v51, %v346_v49 }
 0x2b3   :  { %v572_v53 = vpop.f32.mrf.mxu1 }
 0x2b4   :  { %v452_v54 = vadd.f32 %v484_v42, %v442_v52 }
 0x2b6   :  { %455 = vst.msk [vmem:[#allocation3 + $0x10] sm:$0xff] %vm40_vm1, %v452_v54 }
 0x2b7   :  { %594 = shalt.err (!%p591_p4)
}
 0x2b8   :  { %s609_s3 = smov 128   ;;  %s610_s0 = smov 8  }
 0x2b9   :  { %467 = dma.vmem_to_hbm [thread:$0]  %s462_s20, 384, %s821_s10, [#allocation4], %s609_s3, %s609_s3, %s610_s0  }
 0x2ba   :  { %603 = dma.done.wait [#allocation4], 384  }
 0x2bb   :  { %604 = vsyncadd [#allocation4], 4294966912 }
 0x2bc   :  { %471 = vsyncpa [#allocation4], 1 }

// kernel: walk_encoder_forward.6
= control target key start
LH: loop header
LB: loop body
LE: loop exit
PB: predicated region body
PF: predicated region fallthrough
CT: control target
= control target key end

     0   :  { %vm40_vm0 = vcmask 261120   ;;  %v527_v2 = vmov 0   ;;  %vm57_vm1 = vcmask 523264   ;;  %v528_v5 = vmov 0.0   ;;  %s681_s0 = inlined_call_operand.vmem [shape: bf16[16,64], index: 0, kind: input, shape index: {}]   ;;  %s682_s1 = inlined_call_operand.vmem [shape: f32[64,32], index: 1, kind: input, shape index: {}]   ;;  %s683_s2 = inlined_call_operand.vmem [shape: f32[16,1], index: 2, kind: input, shape index: {}]   ;;  %s684_s3 = inlined_call_operand.vmem [shape: f32[16,32], index: 3, kind: input, shape index: {}]   ;;  %s685_s4 = inlined_call_operand.vmem [shape: f32[32,32], index: 4, kind: input, shape index: {}]   ;;  %s686_s5 = inlined_call_operand.vmem [shape: f32[1,32], index: 5, kind: input, shape index: {}]   ;;  %s687_s6 = inlined_call_operand.vmem [shape: f32[1,32], index: 6, kind: input, shape index: {}]   ;;  %s688_s7 = inlined_call_operand.vmem [shape: f32[1,32], index: 7, kind: input, shape index: {}]   ;;  %s689_s8 = inlined_call_operand.vmem [shape: f32[32,32], index: 8, kind: input, shape index: {}]   ;;  %s690_s9 = inlined_call_operand.vmem [shape: f32[1,32], index: 9, kind: input, shape index: {}]   ;;  %s691_s10 = inlined_call_operand.hbm [shape: f32[16,32], index: 10, kind: output, shape index: {}]  }
   0x1   :  { %v56_v0 = vld [vmem:[%s682_s1 + $0x38] sm:$0xff]  ;;  %v55_v1 = vld [vmem:[%s682_s1 + $0x30] sm:$0xff]  ;;  %502 = vset.pattern.permute.xlu0 %v527_v2  ;;  %v54_v3 = vld [vmem:[%s682_s1 + $0x28] sm:$0xff]  ;;  %42 = vst.msk [vmem:[#allocation2 + $0x8] sm:$0xff] %vm40_vm0, %v528_v5 }
   0x2   :  { %456 = vmatprep.subr.mxu0 %v56_v0  ;;  %v431_v4 = vld [vmem:[%s681_s0] sm:$0xff]   ;;  %41 = vst.msk [vmem:[#allocation2] sm:$0xff] %vm40_vm0, %v528_v5 }
   0x3   :  { %457 = vmatpush3.msra.mxu0 %v56_v0  ;;  %v432_v6 = vunpack.c.l.bf16 %v431_v4  ;;  %v149_v7 = vld [vmem:[%s683_s2] sm:$0xff] }
   0x4   :  { %458 = vmatprep.subr.mxu0 %v55_v1 }
   0x5   :  { %15 = vsyncpa [#allocation4], 0  ;;  %459 = vmatpush3.msra.mxu0 %v55_v1  ;;  %v53_v8 = vld [vmem:[%s682_s1 + $0x20] sm:$0xff]  ;;  %153 = vperm.xlu0 %502, %v149_v7   ;;  %v150_v9 = vld [vmem:[%s683_s2 + $0x8] sm:$0xff]  ;;  %v433_v14 = vunpack.c.h.bf16 %v431_v4  ;;  %s529_s13 = smov [#allocation3]  }
   0x6   :  { %460 = vmatprep.subr.mxu0 %v54_v3  ;;  %472 = vmatprep.mubr.msk.f32.mxu0 %vm57_vm1, %v432_v6  ;;  %v52_v10 = vld [vmem:[%s682_s1 + $0x18] sm:$0xff]  ;;  %v51_v11 = vld [vmem:[%s682_s1 + $0x10] sm:$0xff]  ;;  %v50_v12 = vld [vmem:[%s682_s1 + $0x8] sm:$0xff]  ;;  %s409_s14 = sshll.u32 %s529_s13, 4  ;;  %s410_s14 = int_to_ptr.vmem [resolvable:$true] %s409_s14 }
   0x7   :  { %461 = vmatpush3.msra.mxu0 %v54_v3  ;;  %v49_v13 = vld [vmem:[%s682_s1] sm:$0xff]  ;;  %v166_v15 = vld [vmem:[%s685_s4 + $0x18] sm:$0xff]  ;;  %v165_v16 = vld [vmem:[%s685_s4 + $0x10] sm:$0xff]  ;;  %s505_s15 = scalar_lea.vmem %s410_s14, 256  ;;  %p510_p1 = scmp.lt.s32.totalorder %s410_s14, %s410_s14 }
   0x8   :  { %462 = vmatprep.subr.mxu0 %v53_v8  ;;  %475 = vmatprep.subr.mxu1 %v166_v15  ;;  %v164_v17 = vld [vmem:[%s685_s4 + $0x8] sm:$0xff]  ;;  %v163_v18 = vld [vmem:[%s685_s4] sm:$0xff]  ;;  %v309_v31 = vld [vmem:[%s689_s8 + $0x18] sm:$0xff]  ;;  %p506_p0 = scmp.ne.s32.totalorder %s410_s14, %s505_s15  ;;  %p511_p2 = scmp.lt.s32.totalorder %s505_s15, %s505_s15 }
   0x9   :  { %463 = vmatpush3.msra.mxu0 %v53_v8  ;;  %158 = vperm.xlu0 %502, %v150_v9   ;;  %v44_v19 = vld [vmem:[#allocation2 + $0x8] sm:$0xff]  ;;  %v43_v21 = vld [vmem:[#allocation2] sm:$0xff]  ;;  %v308_v32 = vld [vmem:[%s689_s8 + $0x10] sm:$0xff] }
   0xa   :  { %464 = vmatprep.subr.mxu0 %v52_v10  ;;  %476 = vmatpush3.msra.mxu1 %v166_v15  ;;  %v307_v33 = vld [vmem:[%s689_s8 + $0x8] sm:$0xff]  ;;  %v306_v34 = vld [vmem:[%s689_s8] sm:$0xff]  ;;  %p512_p3 = por %p511_p2, %p510_p1 }
   0xb   :  { %465 = vmatpush3.msra.mxu0 %v52_v10  ;;  %477 = vmatprep.subr.mxu1 %v165_v16  ;;  %v422_v35 = vld [vmem:[%s686_s5] ss:$0 sm:$0xff] }
   0xc   :  { %466 = vmatprep.subr.mxu0 %v51_v11  ;;  %478 = vmatpush3.msra.mxu1 %v165_v16  ;;  %v425_v2 = vld [vmem:[%s687_s6] ss:$0 sm:$0xff]  ;;  %p513_p4 = pnand %p512_p3, %p506_p0 }
   0xd   :  { %467 = vmatpush3.msra.mxu0 %v51_v11  ;;  %479 = vmatprep.subr.mxu1 %v164_v17  ;;  %v426_v5 = vld [vmem:[%s688_s7] ss:$0 sm:$0xff] }
   0xe   :  { %468 = vmatprep.subr.mxu0 %v50_v12  ;;  %480 = vmatpush3.msra.mxu1 %v164_v17  ;;  %v304_v15 = vld [vmem:[%s684_s3] sm:$0xff] }
   0xf   :  { %469 = vmatpush3.msra.mxu0 %v50_v12  ;;  %481 = vmatprep.subr.mxu1 %v163_v18  ;;  %v305_v12 = vld [vmem:[%s684_s3 + $0x8] sm:$0xff] }
  0x10   :  { %470 = vmatprep.subr.mxu0 %v49_v13  ;;  %482 = vmatpush3.msra.mxu1 %v163_v18 }
  0x11   :  { %471 = vmatpush3.msra.mxu0 %v49_v13  ;;  %486 = vmatprep.subr.mxu1 %v309_v31 }
  0x12   :  { %473 = vmatmul.mubr.msk.f32.vlgmr.msra.gmra.mxu0 %vm57_vm1, %v433_v14  ;;  %v429_v14 = vld [vmem:[%s690_s9] ss:$0 sm:$0xff] }
  0x80   :  { %v154_v25 = vpop.permute.xlu0 %153 }
  0x84   :  { %v159_v26 = vpop.permute.xlu0 %158 }
  0xd2   :  { %v474_v20 = vpop.f32.mrf.mxu0 }
  0xd3   :  { %v140_v22 = vadd.f32 %v474_v20, %v44_v19 }
  0xd4   :  { %v130_v23 = vpop.f32.mrf.mxu0 }
  0xd5   :  { %143 = vst.msk [vmem:[#allocation2 + $0x8] sm:$0xff] %vm40_vm0, %v140_v22  ;;  %v139_v24 = vadd.f32 %v130_v23, %v43_v21 }
  0xd7   :  { %142 = vst.msk [vmem:[#allocation2] sm:$0xff] %vm40_vm0, %v139_v24 }
  0xdc   :  { %v148_v27 = vld [vmem:[#allocation2 + $0x8] sm:$0xff] }
  0xdd   :  { %v162_v30 = vmul.f32 %v159_v26, %v148_v27 }
  0xde   :  { %v147_v28 = vld [vmem:[#allocation2] sm:$0xff] }
  0xdf   :  { %v161_v29 = vmul.f32 %v154_v25, %v147_v28 }
  0xe1   :  { %483 = vmatprep.mubr.msk.f32.mxu1 %vm40_vm0, %v161_v29 }
  0xe2   :  { %484 = vmatmul.mubr.msk.f32.vlgmr.msra.gmra.mxu1 %vm40_vm0, %v162_v30 }
  0xe3   :  { %487 = vmatpush3.msra.mxu1 %v309_v31 }
  0xe4   :  { %488 = vmatprep.subr.mxu1 %v308_v32 }
  0xe5   :  { %489 = vmatpush3.msra.mxu1 %v308_v32 }
  0xe6   :  { %490 = vmatprep.subr.mxu1 %v307_v33 }
  0xe7   :  { %491 = vmatpush3.msra.mxu1 %v307_v33 }
  0xe8   :  { %492 = vmatprep.subr.mxu1 %v306_v34 }
  0xe9   :  { %493 = vmatpush3.msra.mxu1 %v306_v34 }
 0x1a2   :  { %v485_v36 = vpop.f32.mrf.mxu1 }
 0x1a3   :  { %v252_v37 = vadd.f32 %v485_v36, %v422_v35 }
 0x1a4   :  { %v246_v38 = vpop.f32.mrf.mxu1 }
 0x1a5   :  { %v247_v39 = vadd.f32 %v422_v35, %v246_v38  ;;  %v256_v40 = vsel %vm40_vm0, %v252_v37, 0.0 }
 0x1a7   :  { %v255_v41 = vsel %vm40_vm0, %v247_v39, 0.0 }
 0x1a8   :  { %v257_v42 = vadd.f32 %v256_v40, %v255_v41 }
 0x1aa   :  { %v258_v43 = vrot.slane %v257_v42, 4 }
 0x1ac   :  { %v259_v44 = vadd.f32 %v258_v43, %v257_v42 }
 0x1ae   :  { %v260_v45 = vrot.slane %v259_v44, 2 }
 0x1b0   :  { %v261_v46 = vadd.f32 %v260_v45, %v259_v44 }
 0x1b2   :  { %v262_v47 = vrot.slane %v261_v46, 1 }
 0x1b4   :  { %v263_v48 = vadd.f32 %v262_v47, %v261_v46 }
 0x1b6   :  { %v265_v49 = vmul.f32 0.0625, %v263_v48 }
 0x1b8   :  { %v266_v50 = vsub.f32 %v247_v39, %v265_v49  ;;  %v267_v51 = vsub.f32 %v252_v37, %v265_v49 }
 0x1ba   :  { %v268_v52 = vmul.f32 %v266_v50, %v266_v50  ;;  %v269_v53 = vmul.f32 %v267_v51, %v267_v51 }
 0x1bc   :  { %v270_v54 = vsel %vm40_vm0, %v268_v52, 0.0  ;;  %v271_v55 = vsel %vm40_vm0, %v269_v53, 0.0 }
 0x1bd   :  { %v272_v56 = vadd.f32 %v271_v55, %v270_v54 }
 0x1bf   :  { %v273_v57 = vrot.slane %v272_v56, 4 }
 0x1c1   :  { %v274_v58 = vadd.f32 %v273_v57, %v272_v56 }
 0x1c3   :  { %v275_v59 = vrot.slane %v274_v58, 2 }
 0x1c5   :  { %v276_v60 = vadd.f32 %v275_v59, %v274_v58 }
 0x1c7   :  { %v277_v61 = vrot.slane %v276_v60, 1 }
 0x1c9   :  { %v278_v62 = vadd.f32 %v277_v61, %v276_v60 }
 0x1cb   :  { %v279_v63 = vmul.f32 0.0625, %v278_v62 }
 0x1cd   :  { %v280_v0 = vadd.f32 1e-05, %v279_v63 }
 0x1cf   :  { %503 = vrsqrt.f32 %v280_v0 }
 0x1dc   :  { %v504_v1 = vpop.eup %503 }
 0x1dd   :  { %v282_v3 = vmul.f32 %v504_v1, %v266_v50  ;;  %v283_v4 = vmul.f32 %v504_v1, %v267_v51 }
 0x1df   :  { %v291_v6 = vmul.f32 %v425_v2, %v282_v3  ;;  %v292_v7 = vmul.f32 %v425_v2, %v283_v4 }
 0x1e1   :  { %v300_v8 = vadd.f32 %v426_v5, %v291_v6  ;;  %v301_v9 = vadd.f32 %v426_v5, %v292_v7 }
 0x1e3   :  { %v302_v10 = vmax.f32 %v300_v8, 0.0  ;;  %v303_v11 = vmax.f32 %v301_v9, 0.0 }
 0x1e5   :  { %494 = vmatprep.mubr.msk.f32.mxu1 %vm40_vm0, %v302_v10 }
 0x1e6   :  { %495 = vmatmul.mubr.msk.f32.vlgmr.msra.gmra.mxu1 %vm40_vm0, %v303_v11 }
 0x2a6   :  { %v496_v13 = vpop.f32.mrf.mxu1 }
 0x2a7   :  { %v392_v16 = vadd.f32 %v496_v13, %v305_v12 }
 0x2a8   :  { %v382_v17 = vpop.f32.mrf.mxu1 }
 0x2a9   :  { %v401_v18 = vadd.f32 %v429_v14, %v392_v16  ;;  %v391_v19 = vadd.f32 %v382_v17, %v304_v15 }
 0x2ab   :  { %403 = vst.msk [vmem:[#allocation3 + $0x8] sm:$0xff] %vm40_vm0, %v401_v18  ;;  %v400_v20 = vadd.f32 %v429_v14, %v391_v19 }
 0x2ad   :  { %402 = vst.msk [vmem:[#allocation3] sm:$0xff] %vm40_vm0, %v400_v20 }
 0x2ae   :  { %516 = shalt.err (!%p513_p4)
}
 0x2af   :  { %s530_s3 = smov 128   ;;  %s531_s9 = smov 8  }
 0x2b0   :  { %415 = dma.vmem_to_hbm [thread:$0]  %s410_s14, 256, %s691_s10, [#allocation4], %s530_s3, %s530_s3, %s531_s9  }
 0x2b1   :  { %525 = dma.done.wait [#allocation4], 256  }
 0x2b2   :  { %526 = vsyncadd [#allocation4], 4294967040 }
 0x2b3   :  { %419 = vsyncpa [#allocation4], 1 }

</bundles_post_ra>
